<compile_context>
chip_gen: v7x
topology: tpu7x:2x2x1
jax: 0.10.0
libtpu: 0.0.40
codegen_flags: <defaults>
</compile_context>

<pallas_src>
import math

import jax
import jax.numpy as jnp
from jax import lax
from jax.experimental import pallas as pl
from jax.experimental.pallas import tpu as pltpu

# ---------------- problem sizes (small, consistent with the module) ----------
B = 2        # batch
S = 8        # target sequence length (x)
SE = 8       # encoder sequence length (e_outputs)
D = 32       # d_model
H = 4        # heads
DK = D // H  # d_k = 8
DFF = 256    # FeedForward hidden dim (default d_ff=256)
EPS = 1e-6

# Row layout of the packed (16, D) vector-parameter slab.
_ROW = dict(n1a=0, n1b=1, n2a=2, n2b=3, n3a=4, n3b=5,
            a1_bq=6, a1_bk=7, a1_bv=8, a1_bo=9,
            a2_bq=10, a2_bk=11, a2_bv=12, a2_bo=13, ff_b2=14)
N_VEC_ROWS = 16  # padded to a full 8-sublane multiple


# ---------------------------- Pallas kernel ----------------------------------
def decoder_layer_kernel(x_ref, e_ref, w_ref, vec_ref,
                         ff_w1_ref, ff_b1_ref, ff_w2_ref, o_ref):
    x = x_ref[...]      # (B*S, D)  f32
    e = e_ref[...]      # (B*SE, D) f32

    # ---- hoist every parameter load once ----
    def row(name):
        r = _ROW[name]
        return vec_ref[r:r + 1, :]          # (1, D) view load

    n1a, n1b = row("n1a"), row("n1b")
    n2a, n2b = row("n2a"), row("n2b")
    n3a, n3b = row("n3a"), row("n3b")
    a1_b = (row("a1_bq"), row("a1_bk"), row("a1_bv"), row("a1_bo"))
    a2_b = (row("a2_bq"), row("a2_bk"), row("a2_bv"), row("a2_bo"))
    ff_b2 = row("ff_b2")
    ff_b1 = ff_b1_ref[...]                  # (1, DFF)
    ff_w1 = ff_w1_ref[...]                  # (D, DFF)
    ff_w2 = ff_w2_ref[...]                  # (DFF, D)
    a1_w = (w_ref[0], w_ref[1], w_ref[2], w_ref[3])   # wq, wk, wv, wo
    a2_w = (w_ref[4], w_ref[5], w_ref[6], w_ref[7])

    inv_sqrt_dk = 1.0 / math.sqrt(DK)

    def _norm(v, alpha, bias):
        mean = jnp.mean(v, axis=-1, keepdims=True)
        d = v - mean
        # PyTorch Tensor.std is unbiased (divide by D-1)
        var = jnp.sum(d * d, axis=-1, keepdims=True) * (1.0 / (D - 1))
        inv = pl.reciprocal(jnp.sqrt(var) + EPS, approx=True)   # EUP slot
        return alpha * (d * inv) + bias

    def _mha(q_in, k_in, v_in, n_q, n_k, weights, biases):
        wq, wk, wv, wo = weights
        bq, bk, bv, bo = biases
        q = jnp.dot(q_in, wq, preferred_element_type=jnp.float32) + bq
        k = jnp.dot(k_in, wk, preferred_element_type=jnp.float32) + bk
        v = jnp.dot(v_in, wv, preferred_element_type=jnp.float32) + bv
        per_batch = []
        for b in range(B):                    # static loops; B*H tiny matmuls
            qb = q[b * n_q:(b + 1) * n_q, :]
            kb = k[b * n_k:(b + 1) * n_k, :]
            vb = v[b * n_k:(b + 1) * n_k, :]
            acc = jnp.zeros((n_q, D), jnp.float32)
            for h in range(H):
                lo = h * DK
                qh = qb[:, lo:lo + DK]        # (n_q, DK)
                kh = kb[:, lo:lo + DK]        # (n_k, DK)
                vh = vb[:, lo:lo + DK]        # (n_k, DK)
                # scores = qh @ kh.T / sqrt(d_k)  (contract on DK, no transpose)
                s = lax.dot_general(qh, kh, (((1,), (1,)), ((), ())),
                                    preferred_element_type=jnp.float32)
                s = s * inv_sqrt_dk
                s = s - jnp.max(s, axis=-1, keepdims=True)
                p = jnp.exp(s)
                p = p * pl.reciprocal(jnp.sum(p, axis=-1, keepdims=True),
                                      approx=True)
                hv = jnp.dot(p, vh, preferred_element_type=jnp.float32)
                # Accumulate head through its out-projection slice: this
                # replaces the lane-axis concatenate of head outputs.
                acc = acc + jnp.dot(hv, wo[lo:lo + DK, :],
                                    preferred_element_type=jnp.float32)
            per_batch.append(acc)
        out = jnp.concatenate(per_batch, axis=0)   # sublane concat, full tiles
        return out + bo

    def _ff(v):
        h1 = jnp.dot(v, ff_w1, preferred_element_type=jnp.float32) + ff_b1
        h1 = jnp.maximum(h1, 0.0)
        return jnp.dot(h1, ff_w2, preferred_element_type=jnp.float32) + ff_b2

    # --- decoder layer forward (dropouts identity, masks ignored) ---
    x2 = _norm(x, n1a, n1b)
    x = x + _mha(x2, x2, x2, S, S, a1_w, a1_b)
    x2 = _norm(x, n2a, n2b)
    x = x + _mha(x2, e, e, S, SE, a2_w, a2_b)
    x2 = _norm(x, n3a, n3b)
    x = x + _ff(x2)

    o_ref[...] = x


# ---------------------------- wrapper -----------------------------------------
def pack_params(p):
    w_attn = jnp.stack(
        [p["a1_wq"], p["a1_wk"], p["a1_wv"], p["a1_wo"],
         p["a2_wq"], p["a2_wk"], p["a2_wv"], p["a2_wo"]], axis=0)   # (8, D, D)
    rows = [None] * N_VEC_ROWS
    for name, r in _ROW.items():
        rows[r] = p[name]
    rows = [r if r is not None else jnp.zeros((1, D), jnp.float32) for r in rows]
    vec = jnp.concatenate(rows, axis=0)                              # (16, D)
    return w_attn, vec, p["ff_w1"], p["ff_b1"], p["ff_w2"]


def decoder_layer(x, e_outputs, params):
    """x: (B, S, D), e_outputs: (B, SE, D). src/trg masks are ignored (ref behavior)."""
    w_attn, vec, ff_w1, ff_b1, ff_w2 = pack_params(params)
    x2d = x.reshape(B * S, D)            # free row-major flatten in the wrapper
    e2d = e_outputs.reshape(B * SE, D)

    def spec(shape):
        n = len(shape)
        return pl.BlockSpec(shape, lambda i, _n=n: (0,) * _n)

    out2d = pl.pallas_call(
        decoder_layer_kernel,
        out_shape=jax.ShapeDtypeStruct((B * S, D), x.dtype),
        grid_spec=pltpu.PrefetchScalarGridSpec(
            num_scalar_prefetch=0,
            grid=(1,),                        # single step: whole batch at once
            in_specs=[
                spec((B * S, D)),             # x (flattened)
                spec((B * SE, D)),            # e_outputs (flattened)
                spec((8, D, D)),              # packed attention weights
                spec((N_VEC_ROWS, D)),        # packed norm params + biases
                spec((D, DFF)),               # ff_w1
                spec((1, DFF)),               # ff_b1
                spec((DFF, D)),               # ff_w2
            ],
            out_specs=spec((B * S, D)),
        ),
        compiler_params=pltpu.CompilerParams(
            dimension_semantics=("arbitrary",)),
    )(x2d, e2d, w_attn, vec, ff_w1, ff_b1, ff_w2)
    return out2d.reshape(B, S, D)


# ---------------------------- pure-JAX reference -------------------------------
def _ref_norm(x, a, b):
    mean = jnp.mean(x, axis=-1, keepdims=True)
    var = jnp.sum((x - mean) ** 2, axis=-1, keepdims=True) / (D - 1)
    return a[0] * (x - mean) / (jnp.sqrt(var) + EPS) + b[0]


def _ref_mha(q_in, k_in, v_in, wq, bq, wk, bk, wv, bv, wo, bo):
    def proj(t, w, bias):
        y = jnp.einsum("bsd,de->bse", t, w) + bias[0]
        return y.reshape(y.shape[0], y.shape[1], H, DK).transpose(0, 2, 1, 3)
    q, k, v = proj(q_in, wq, bq), proj(k_in, wk, bk), proj(v_in, wv, bv)
    scores = jnp.einsum("bhqd,bhkd->bhqk", q, k) / math.sqrt(DK)
    scores = jax.nn.softmax(scores, axis=-1)
    out = jnp.einsum("bhqk,bhkd->bhqd", scores, v)
    out = out.transpose(0, 2, 1, 3).reshape(q_in.shape[0], -1, D)
    return jnp.einsum("bsd,de->bse", out, wo) + bo[0]


def decoder_layer_reference(x, e, p):
    x2 = _ref_norm(x, p["n1a"], p["n1b"])
    x = x + _ref_mha(x2, x2, x2, p["a1_wq"], p["a1_bq"], p["a1_wk"], p["a1_bk"],
                     p["a1_wv"], p["a1_bv"], p["a1_wo"], p["a1_bo"])
    x2 = _ref_norm(x, p["n2a"], p["n2b"])
    x = x + _ref_mha(x2, e, e, p["a2_wq"], p["a2_bq"], p["a2_wk"], p["a2_bk"],
                     p["a2_wv"], p["a2_bv"], p["a2_wo"], p["a2_bo"])
    x2 = _ref_norm(x, p["n3a"], p["n3b"])
    h = jax.nn.relu(jnp.einsum("bsd,df->bsf", x2, p["ff_w1"]) + p["ff_b1"][0])
    x = x + jnp.einsum("bsf,fd->bsd", h, p["ff_w2"]) + p["ff_b2"][0]
    return x


# ---------------------------- param init & main --------------------------------
def init_params(key):
    ks = jax.random.split(key, 32)
    i = iter(range(32))

    def lin(k_w, k_b, din, dout):
        scale = 1.0 / math.sqrt(din)
        w = jax.random.uniform(k_w, (din, dout), jnp.float32, -scale, scale)
        bias = jax.random.uniform(k_b, (1, dout), jnp.float32, -scale, scale)
        return w, bias

    p = {}
    # Norm params: alpha=ones, bias=zeros (as in the module __init__)
    for n in ("n1", "n2", "n3"):
        p[n + "a"] = jnp.ones((1, D), jnp.float32)
        p[n + "b"] = jnp.zeros((1, D), jnp.float32)
    for a in ("a1", "a2"):
        for name in ("q", "k", "v", "o"):
            w, bias = lin(ks[next(i)], ks[next(i)], D, D)
            p[f"{a}_w{name}"] = w
            p[f"{a}_b{name}"] = bias
    p["ff_w1"], p["ff_b1"] = lin(ks[next(i)], ks[next(i)], D, DFF)
    p["ff_w2"], p["ff_b2"] = lin(ks[next(i)], ks[next(i)], DFF, D)
    return p


if __name__ == "__main__":
    key = jax.random.PRNGKey(0)
    k_x, k_e, k_p = jax.random.split(key, 3)
    x = jax.random.normal(k_x, (B, S, D), jnp.float32)
    e_outputs = jax.random.normal(k_e, (B, SE, D), jnp.float32)
    params = init_params(k_p)

    out = decoder_layer(x, e_outputs, params)
    out = jax.block_until_ready(out)

    ref = decoder_layer_reference(x, e_outputs, params)
    assert out.shape == (B, S, D)
    # approx-reciprocal (EUP) softmax/norm => slightly looser tolerance than exact divide
    assert jnp.allclose(out, ref, atol=2e-3, rtol=2e-3), "mismatch vs reference"

    print("KERNEL_OK")
</pallas_src>

<mosaic_0001>
module attributes {stable_mosaic.version = 11 : i64} {
  func.func @decoder_layer_kernel(%arg0: i32, %arg1: memref<16x32xf32, #tpu.memory_space<vmem>>, %arg2: memref<16x32xf32, #tpu.memory_space<vmem>>, %arg3: memref<8x32x32xf32, #tpu.memory_space<vmem>>, %arg4: memref<16x32xf32, #tpu.memory_space<vmem>>, %arg5: memref<32x256xf32, #tpu.memory_space<vmem>>, %arg6: memref<1x256xf32, #tpu.memory_space<vmem>>, %arg7: memref<256x32xf32, #tpu.memory_space<vmem>>, %arg8: memref<16x32xf32, #tpu.memory_space<vmem>>) attributes {dimension_semantics = [#tpu.dimension_semantics<arbitrary>], iteration_bounds = array<i64: 1>, scalar_prefetch = 0 : i64, scratch_operands = 0 : i64, tpu.core_type = #tpu.core_type<tc>, window_params = [{pipeline_mode = #tpu.pipeline_mode<synchronous>, transform_indices = @transform_0, window_bounds = array<i64: 16, 32>}, {pipeline_mode = #tpu.pipeline_mode<synchronous>, transform_indices = @transform_1, window_bounds = array<i64: 16, 32>}, {pipeline_mode = #tpu.pipeline_mode<synchronous>, transform_indices = @transform_2, window_bounds = array<i64: 8, 32, 32>}, {pipeline_mode = #tpu.pipeline_mode<synchronous>, transform_indices = @transform_3, window_bounds = array<i64: 16, 32>}, {pipeline_mode = #tpu.pipeline_mode<synchronous>, transform_indices = @transform_4, window_bounds = array<i64: 32, 256>}, {pipeline_mode = #tpu.pipeline_mode<synchronous>, transform_indices = @transform_5, window_bounds = array<i64: 1, 256>}, {pipeline_mode = #tpu.pipeline_mode<synchronous>, transform_indices = @transform_6, window_bounds = array<i64: 256, 32>}, {pipeline_mode = #tpu.pipeline_mode<synchronous>, transform_indices = @transform_7, window_bounds = array<i64: 16, 32>}]} {
    %c0 = arith.constant 0 : index
    %c0_0 = arith.constant 0 : index
    %0 = vector.load %arg1[%c0, %c0_0] : memref<16x32xf32, #tpu.memory_space<vmem>>, vector<16x32xf32>
    %c0_1 = arith.constant 0 : index
    %c0_2 = arith.constant 0 : index
    %1 = vector.load %arg2[%c0_1, %c0_2] : memref<16x32xf32, #tpu.memory_space<vmem>>, vector<16x32xf32>
    %c0_3 = arith.constant 0 : index
    %c0_4 = arith.constant 0 : index
    %2 = vector.load %arg4[%c0_3, %c0_4] : memref<16x32xf32, #tpu.memory_space<vmem>>, vector<1x32xf32>
    %c1 = arith.constant 1 : index
    %c0_5 = arith.constant 0 : index
    %3 = vector.load %arg4[%c1, %c0_5] : memref<16x32xf32, #tpu.memory_space<vmem>>, vector<1x32xf32>
    %c2 = arith.constant 2 : index
    %c0_6 = arith.constant 0 : index
    %4 = vector.load %arg4[%c2, %c0_6] : memref<16x32xf32, #tpu.memory_space<vmem>>, vector<1x32xf32>
    %c3 = arith.constant 3 : index
    %c0_7 = arith.constant 0 : index
    %5 = vector.load %arg4[%c3, %c0_7] : memref<16x32xf32, #tpu.memory_space<vmem>>, vector<1x32xf32>
    %c4 = arith.constant 4 : index
    %c0_8 = arith.constant 0 : index
    %6 = vector.load %arg4[%c4, %c0_8] : memref<16x32xf32, #tpu.memory_space<vmem>>, vector<1x32xf32>
    %c5 = arith.constant 5 : index
    %c0_9 = arith.constant 0 : index
    %7 = vector.load %arg4[%c5, %c0_9] : memref<16x32xf32, #tpu.memory_space<vmem>>, vector<1x32xf32>
    %c6 = arith.constant 6 : index
    %c0_10 = arith.constant 0 : index
    %8 = vector.load %arg4[%c6, %c0_10] : memref<16x32xf32, #tpu.memory_space<vmem>>, vector<1x32xf32>
    %c7 = arith.constant 7 : index
    %c0_11 = arith.constant 0 : index
    %9 = vector.load %arg4[%c7, %c0_11] : memref<16x32xf32, #tpu.memory_space<vmem>>, vector<1x32xf32>
    %c8 = arith.constant 8 : index
    %c0_12 = arith.constant 0 : index
    %10 = vector.load %arg4[%c8, %c0_12] : memref<16x32xf32, #tpu.memory_space<vmem>>, vector<1x32xf32>
    %c9 = arith.constant 9 : index
    %c0_13 = arith.constant 0 : index
    %11 = vector.load %arg4[%c9, %c0_13] : memref<16x32xf32, #tpu.memory_space<vmem>>, vector<1x32xf32>
    %c10 = arith.constant 10 : index
    %c0_14 = arith.constant 0 : index
    %12 = vector.load %arg4[%c10, %c0_14] : memref<16x32xf32, #tpu.memory_space<vmem>>, vector<1x32xf32>
    %c11 = arith.constant 11 : index
    %c0_15 = arith.constant 0 : index
    %13 = vector.load %arg4[%c11, %c0_15] : memref<16x32xf32, #tpu.memory_space<vmem>>, vector<1x32xf32>
    %c12 = arith.constant 12 : index
    %c0_16 = arith.constant 0 : index
    %14 = vector.load %arg4[%c12, %c0_16] : memref<16x32xf32, #tpu.memory_space<vmem>>, vector<1x32xf32>
    %c13 = arith.constant 13 : index
    %c0_17 = arith.constant 0 : index
    %15 = vector.load %arg4[%c13, %c0_17] : memref<16x32xf32, #tpu.memory_space<vmem>>, vector<1x32xf32>
    %c14 = arith.constant 14 : index
    %c0_18 = arith.constant 0 : index
    %16 = vector.load %arg4[%c14, %c0_18] : memref<16x32xf32, #tpu.memory_space<vmem>>, vector<1x32xf32>
    %c0_19 = arith.constant 0 : index
    %c0_20 = arith.constant 0 : index
    %17 = vector.load %arg6[%c0_19, %c0_20] : memref<1x256xf32, #tpu.memory_space<vmem>>, vector<1x256xf32>
    %c0_21 = arith.constant 0 : index
    %c0_22 = arith.constant 0 : index
    %18 = vector.load %arg5[%c0_21, %c0_22] : memref<32x256xf32, #tpu.memory_space<vmem>>, vector<32x256xf32>
    %c0_23 = arith.constant 0 : index
    %c0_24 = arith.constant 0 : index
    %19 = vector.load %arg7[%c0_23, %c0_24] : memref<256x32xf32, #tpu.memory_space<vmem>>, vector<256x32xf32>
    %c0_25 = arith.constant 0 : index
    %c0_26 = arith.constant 0 : index
    %c0_27 = arith.constant 0 : index
    %20 = vector.load %arg3[%c0_25, %c0_26, %c0_27] : memref<8x32x32xf32, #tpu.memory_space<vmem>>, vector<1x32x32xf32>
    %21 = vector.shape_cast %20 : vector<1x32x32xf32> to vector<32x32xf32>
    %c1_28 = arith.constant 1 : index
    %c0_29 = arith.constant 0 : index
    %c0_30 = arith.constant 0 : index
    %22 = vector.load %arg3[%c1_28, %c0_29, %c0_30] : memref<8x32x32xf32, #tpu.memory_space<vmem>>, vector<1x32x32xf32>
    %23 = vector.shape_cast %22 : vector<1x32x32xf32> to vector<32x32xf32>
    %c2_31 = arith.constant 2 : index
    %c0_32 = arith.constant 0 : index
    %c0_33 = arith.constant 0 : index
    %24 = vector.load %arg3[%c2_31, %c0_32, %c0_33] : memref<8x32x32xf32, #tpu.memory_space<vmem>>, vector<1x32x32xf32>
    %25 = vector.shape_cast %24 : vector<1x32x32xf32> to vector<32x32xf32>
    %c3_34 = arith.constant 3 : index
    %c0_35 = arith.constant 0 : index
    %c0_36 = arith.constant 0 : index
    %26 = vector.load %arg3[%c3_34, %c0_35, %c0_36] : memref<8x32x32xf32, #tpu.memory_space<vmem>>, vector<1x32x32xf32>
    %27 = vector.shape_cast %26 : vector<1x32x32xf32> to vector<32x32xf32>
    %c4_37 = arith.constant 4 : index
    %c0_38 = arith.constant 0 : index
    %c0_39 = arith.constant 0 : index
    %28 = vector.load %arg3[%c4_37, %c0_38, %c0_39] : memref<8x32x32xf32, #tpu.memory_space<vmem>>, vector<1x32x32xf32>
    %29 = vector.shape_cast %28 : vector<1x32x32xf32> to vector<32x32xf32>
    %c5_40 = arith.constant 5 : index
    %c0_41 = arith.constant 0 : index
    %c0_42 = arith.constant 0 : index
    %30 = vector.load %arg3[%c5_40, %c0_41, %c0_42] : memref<8x32x32xf32, #tpu.memory_space<vmem>>, vector<1x32x32xf32>
    %31 = vector.shape_cast %30 : vector<1x32x32xf32> to vector<32x32xf32>
    %c6_43 = arith.constant 6 : index
    %c0_44 = arith.constant 0 : index
    %c0_45 = arith.constant 0 : index
    %32 = vector.load %arg3[%c6_43, %c0_44, %c0_45] : memref<8x32x32xf32, #tpu.memory_space<vmem>>, vector<1x32x32xf32>
    %33 = vector.shape_cast %32 : vector<1x32x32xf32> to vector<32x32xf32>
    %c7_46 = arith.constant 7 : index
    %c0_47 = arith.constant 0 : index
    %c0_48 = arith.constant 0 : index
    %34 = vector.load %arg3[%c7_46, %c0_47, %c0_48] : memref<8x32x32xf32, #tpu.memory_space<vmem>>, vector<1x32x32xf32>
    %35 = vector.shape_cast %34 : vector<1x32x32xf32> to vector<32x32xf32>
    %cst = arith.constant dense<0.000000e+00> : vector<16xf32>
    %36 = vector.multi_reduction <add>, %0, %cst [1] : vector<16x32xf32> to vector<16xf32>
    %37 = vector.shape_cast %36 : vector<16xf32> to vector<16x1xf32>
    %cst_49 = arith.constant 3.200000e+01 : f32
    %38 = vector.broadcast %cst_49 : f32 to vector<16x1xf32>
    %39 = arith.divf %37, %38 : vector<16x1xf32>
    %40 = vector.broadcast %39 : vector<16x1xf32> to vector<16x32xf32>
    %41 = arith.subf %0, %40 : vector<16x32xf32>
    %42 = arith.mulf %41, %41 : vector<16x32xf32>
    %cst_50 = arith.constant dense<0.000000e+00> : vector<16xf32>
    %43 = vector.multi_reduction <add>, %42, %cst_50 [1] : vector<16x32xf32> to vector<16xf32>
    %44 = vector.shape_cast %43 : vector<16xf32> to vector<16x1xf32>
    %cst_51 = arith.constant 0.0322580636 : f32
    %45 = vector.broadcast %cst_51 : f32 to vector<16x1xf32>
    %46 = arith.mulf %44, %45 : vector<16x1xf32>
    %47 = math.sqrt %46 : vector<16x1xf32>
    %cst_52 = arith.constant 9.99999997E-7 : f32
    %48 = vector.broadcast %cst_52 : f32 to vector<16x1xf32>
    %49 = arith.addf %47, %48 : vector<16x1xf32>
    %50 = tpu.reciprocal %49 {approx = true} : vector<16x1xf32> -> vector<16x1xf32>
    %51 = vector.broadcast %50 : vector<16x1xf32> to vector<16x32xf32>
    %52 = arith.mulf %41, %51 : vector<16x32xf32>
    %53 = vector.broadcast %2 : vector<1x32xf32> to vector<16x32xf32>
    %54 = arith.mulf %53, %52 : vector<16x32xf32>
    %55 = vector.broadcast %3 : vector<1x32xf32> to vector<16x32xf32>
    %56 = arith.addf %54, %55 : vector<16x32xf32>
    %cst_53 = arith.constant dense<0.000000e+00> : vector<16x32xf32>
    %57 = tpu.matmul %56, %21, %cst_53 {dimension_numbers = #tpu.dot_dimension_numbers<[1], [0], [0], [1], [0, 0, 1, 1], [], []>} : vector<16x32xf32>, vector<32x32xf32>, vector<16x32xf32> -> vector<16x32xf32>
    %58 = vector.broadcast %8 : vector<1x32xf32> to vector<16x32xf32>
    %59 = arith.addf %57, %58 : vector<16x32xf32>
    %cst_54 = arith.constant dense<0.000000e+00> : vector<16x32xf32>
    %60 = tpu.matmul %56, %23, %cst_54 {dimension_numbers = #tpu.dot_dimension_numbers<[1], [0], [0], [1], [0, 0, 1, 1], [], []>} : vector<16x32xf32>, vector<32x32xf32>, vector<16x32xf32> -> vector<16x32xf32>
    %61 = vector.broadcast %9 : vector<1x32xf32> to vector<16x32xf32>
    %62 = arith.addf %60, %61 : vector<16x32xf32>
    %cst_55 = arith.constant dense<0.000000e+00> : vector<16x32xf32>
    %63 = tpu.matmul %56, %25, %cst_55 {dimension_numbers = #tpu.dot_dimension_numbers<[1], [0], [0], [1], [0, 0, 1, 1], [], []>} : vector<16x32xf32>, vector<32x32xf32>, vector<16x32xf32> -> vector<16x32xf32>
    %64 = vector.broadcast %10 : vector<1x32xf32> to vector<16x32xf32>
    %65 = arith.addf %63, %64 : vector<16x32xf32>
    %66 = vector.extract_strided_slice %59 {offsets = [0, 0], sizes = [8, 32], strides = [1, 1]} : vector<16x32xf32> to vector<8x32xf32>
    %67 = vector.extract_strided_slice %62 {offsets = [0, 0], sizes = [8, 32], strides = [1, 1]} : vector<16x32xf32> to vector<8x32xf32>
    %68 = vector.extract_strided_slice %65 {offsets = [0, 0], sizes = [8, 32], strides = [1, 1]} : vector<16x32xf32> to vector<8x32xf32>
    %cst_56 = arith.constant 0.000000e+00 : f32
    %69 = vector.broadcast %cst_56 : f32 to vector<8x32xf32>
    %70 = vector.extract_strided_slice %66 {offsets = [0, 0], sizes = [8, 8], strides = [1, 1]} : vector<8x32xf32> to vector<8x8xf32>
    %71 = vector.extract_strided_slice %67 {offsets = [0, 0], sizes = [8, 8], strides = [1, 1]} : vector<8x32xf32> to vector<8x8xf32>
    %72 = vector.extract_strided_slice %68 {offsets = [0, 0], sizes = [8, 8], strides = [1, 1]} : vector<8x32xf32> to vector<8x8xf32>
    %cst_57 = arith.constant dense<0.000000e+00> : vector<8x8xf32>
    %73 = tpu.matmul %70, %71, %cst_57 {dimension_numbers = #tpu.dot_dimension_numbers<[1], [1], [0], [0], [0, 0, 1, 0], [], []>} : vector<8x8xf32>, vector<8x8xf32>, vector<8x8xf32> -> vector<8x8xf32>
    %cst_58 = arith.constant 0.353553385 : f32
    %74 = vector.broadcast %cst_58 : f32 to vector<8x8xf32>
    %75 = arith.mulf %73, %74 : vector<8x8xf32>
    %cst_59 = arith.constant dense<0xFF800000> : vector<8xf32>
    %76 = vector.multi_reduction <maximumf>, %75, %cst_59 [1] : vector<8x8xf32> to vector<8xf32>
    %77 = vector.shape_cast %76 : vector<8xf32> to vector<8x1xf32>
    %78 = vector.broadcast %77 : vector<8x1xf32> to vector<8x8xf32>
    %79 = arith.subf %75, %78 : vector<8x8xf32>
    %80 = math.exp %79 : vector<8x8xf32>
    %cst_60 = arith.constant dense<0.000000e+00> : vector<8xf32>
    %81 = vector.multi_reduction <add>, %80, %cst_60 [1] : vector<8x8xf32> to vector<8xf32>
    %82 = vector.shape_cast %81 : vector<8xf32> to vector<8x1xf32>
    %83 = tpu.reciprocal %82 {approx = true} : vector<8x1xf32> -> vector<8x1xf32>
    %84 = vector.broadcast %83 : vector<8x1xf32> to vector<8x8xf32>
    %85 = arith.mulf %80, %84 : vector<8x8xf32>
    %cst_61 = arith.constant dense<0.000000e+00> : vector<8x8xf32>
    %86 = tpu.matmul %85, %72, %cst_61 {dimension_numbers = #tpu.dot_dimension_numbers<[1], [0], [0], [1], [0, 0, 1, 1], [], []>} : vector<8x8xf32>, vector<8x8xf32>, vector<8x8xf32> -> vector<8x8xf32>
    %87 = vector.extract_strided_slice %27 {offsets = [0, 0], sizes = [8, 32], strides = [1, 1]} : vector<32x32xf32> to vector<8x32xf32>
    %cst_62 = arith.constant dense<0.000000e+00> : vector<8x32xf32>
    %88 = tpu.matmul %86, %87, %cst_62 {dimension_numbers = #tpu.dot_dimension_numbers<[1], [0], [0], [1], [0, 0, 1, 1], [], []>} : vector<8x8xf32>, vector<8x32xf32>, vector<8x32xf32> -> vector<8x32xf32>
    %89 = arith.addf %69, %88 : vector<8x32xf32>
    %90 = vector.extract_strided_slice %66 {offsets = [0, 8], sizes = [8, 8], strides = [1, 1]} : vector<8x32xf32> to vector<8x8xf32>
    %91 = vector.extract_strided_slice %67 {offsets = [0, 8], sizes = [8, 8], strides = [1, 1]} : vector<8x32xf32> to vector<8x8xf32>
    %92 = vector.extract_strided_slice %68 {offsets = [0, 8], sizes = [8, 8], strides = [1, 1]} : vector<8x32xf32> to vector<8x8xf32>
    %cst_63 = arith.constant dense<0.000000e+00> : vector<8x8xf32>
    %93 = tpu.matmul %90, %91, %cst_63 {dimension_numbers = #tpu.dot_dimension_numbers<[1], [1], [0], [0], [0, 0, 1, 0], [], []>} : vector<8x8xf32>, vector<8x8xf32>, vector<8x8xf32> -> vector<8x8xf32>
    %cst_64 = arith.constant 0.353553385 : f32
    %94 = vector.broadcast %cst_64 : f32 to vector<8x8xf32>
    %95 = arith.mulf %93, %94 : vector<8x8xf32>
    %cst_65 = arith.constant dense<0xFF800000> : vector<8xf32>
    %96 = vector.multi_reduction <maximumf>, %95, %cst_65 [1] : vector<8x8xf32> to vector<8xf32>
    %97 = vector.shape_cast %96 : vector<8xf32> to vector<8x1xf32>
    %98 = vector.broadcast %97 : vector<8x1xf32> to vector<8x8xf32>
    %99 = arith.subf %95, %98 : vector<8x8xf32>
    %100 = math.exp %99 : vector<8x8xf32>
    %cst_66 = arith.constant dense<0.000000e+00> : vector<8xf32>
    %101 = vector.multi_reduction <add>, %100, %cst_66 [1] : vector<8x8xf32> to vector<8xf32>
    %102 = vector.shape_cast %101 : vector<8xf32> to vector<8x1xf32>
    %103 = tpu.reciprocal %102 {approx = true} : vector<8x1xf32> -> vector<8x1xf32>
    %104 = vector.broadcast %103 : vector<8x1xf32> to vector<8x8xf32>
    %105 = arith.mulf %100, %104 : vector<8x8xf32>
    %cst_67 = arith.constant dense<0.000000e+00> : vector<8x8xf32>
    %106 = tpu.matmul %105, %92, %cst_67 {dimension_numbers = #tpu.dot_dimension_numbers<[1], [0], [0], [1], [0, 0, 1, 1], [], []>} : vector<8x8xf32>, vector<8x8xf32>, vector<8x8xf32> -> vector<8x8xf32>
    %107 = vector.extract_strided_slice %27 {offsets = [8, 0], sizes = [8, 32], strides = [1, 1]} : vector<32x32xf32> to vector<8x32xf32>
    %cst_68 = arith.constant dense<0.000000e+00> : vector<8x32xf32>
    %108 = tpu.matmul %106, %107, %cst_68 {dimension_numbers = #tpu.dot_dimension_numbers<[1], [0], [0], [1], [0, 0, 1, 1], [], []>} : vector<8x8xf32>, vector<8x32xf32>, vector<8x32xf32> -> vector<8x32xf32>
    %109 = arith.addf %89, %108 : vector<8x32xf32>
    %110 = vector.extract_strided_slice %66 {offsets = [0, 16], sizes = [8, 8], strides = [1, 1]} : vector<8x32xf32> to vector<8x8xf32>
    %111 = vector.extract_strided_slice %67 {offsets = [0, 16], sizes = [8, 8], strides = [1, 1]} : vector<8x32xf32> to vector<8x8xf32>
    %112 = vector.extract_strided_slice %68 {offsets = [0, 16], sizes = [8, 8], strides = [1, 1]} : vector<8x32xf32> to vector<8x8xf32>
    %cst_69 = arith.constant dense<0.000000e+00> : vector<8x8xf32>
    %113 = tpu.matmul %110, %111, %cst_69 {dimension_numbers = #tpu.dot_dimension_numbers<[1], [1], [0], [0], [0, 0, 1, 0], [], []>} : vector<8x8xf32>, vector<8x8xf32>, vector<8x8xf32> -> vector<8x8xf32>
    %cst_70 = arith.constant 0.353553385 : f32
    %114 = vector.broadcast %cst_70 : f32 to vector<8x8xf32>
    %115 = arith.mulf %113, %114 : vector<8x8xf32>
    %cst_71 = arith.constant dense<0xFF800000> : vector<8xf32>
    %116 = vector.multi_reduction <maximumf>, %115, %cst_71 [1] : vector<8x8xf32> to vector<8xf32>
    %117 = vector.shape_cast %116 : vector<8xf32> to vector<8x1xf32>
    %118 = vector.broadcast %117 : vector<8x1xf32> to vector<8x8xf32>
    %119 = arith.subf %115, %118 : vector<8x8xf32>
    %120 = math.exp %119 : vector<8x8xf32>
    %cst_72 = arith.constant dense<0.000000e+00> : vector<8xf32>
    %121 = vector.multi_reduction <add>, %120, %cst_72 [1] : vector<8x8xf32> to vector<8xf32>
    %122 = vector.shape_cast %121 : vector<8xf32> to vector<8x1xf32>
    %123 = tpu.reciprocal %122 {approx = true} : vector<8x1xf32> -> vector<8x1xf32>
    %124 = vector.broadcast %123 : vector<8x1xf32> to vector<8x8xf32>
    %125 = arith.mulf %120, %124 : vector<8x8xf32>
    %cst_73 = arith.constant dense<0.000000e+00> : vector<8x8xf32>
    %126 = tpu.matmul %125, %112, %cst_73 {dimension_numbers = #tpu.dot_dimension_numbers<[1], [0], [0], [1], [0, 0, 1, 1], [], []>} : vector<8x8xf32>, vector<8x8xf32>, vector<8x8xf32> -> vector<8x8xf32>
    %127 = vector.extract_strided_slice %27 {offsets = [16, 0], sizes = [8, 32], strides = [1, 1]} : vector<32x32xf32> to vector<8x32xf32>
    %cst_74 = arith.constant dense<0.000000e+00> : vector<8x32xf32>
    %128 = tpu.matmul %126, %127, %cst_74 {dimension_numbers = #tpu.dot_dimension_numbers<[1], [0], [0], [1], [0, 0, 1, 1], [], []>} : vector<8x8xf32>, vector<8x32xf32>, vector<8x32xf32> -> vector<8x32xf32>
    %129 = arith.addf %109, %128 : vector<8x32xf32>
    %130 = vector.extract_strided_slice %66 {offsets = [0, 24], sizes = [8, 8], strides = [1, 1]} : vector<8x32xf32> to vector<8x8xf32>
    %131 = vector.extract_strided_slice %67 {offsets = [0, 24], sizes = [8, 8], strides = [1, 1]} : vector<8x32xf32> to vector<8x8xf32>
    %132 = vector.extract_strided_slice %68 {offsets = [0, 24], sizes = [8, 8], strides = [1, 1]} : vector<8x32xf32> to vector<8x8xf32>
    %cst_75 = arith.constant dense<0.000000e+00> : vector<8x8xf32>
    %133 = tpu.matmul %130, %131, %cst_75 {dimension_numbers = #tpu.dot_dimension_numbers<[1], [1], [0], [0], [0, 0, 1, 0], [], []>} : vector<8x8xf32>, vector<8x8xf32>, vector<8x8xf32> -> vector<8x8xf32>
    %cst_76 = arith.constant 0.353553385 : f32
    %134 = vector.broadcast %cst_76 : f32 to vector<8x8xf32>
    %135 = arith.mulf %133, %134 : vector<8x8xf32>
    %cst_77 = arith.constant dense<0xFF800000> : vector<8xf32>
    %136 = vector.multi_reduction <maximumf>, %135, %cst_77 [1] : vector<8x8xf32> to vector<8xf32>
    %137 = vector.shape_cast %136 : vector<8xf32> to vector<8x1xf32>
    %138 = vector.broadcast %137 : vector<8x1xf32> to vector<8x8xf32>
    %139 = arith.subf %135, %138 : vector<8x8xf32>
    %140 = math.exp %139 : vector<8x8xf32>
    %cst_78 = arith.constant dense<0.000000e+00> : vector<8xf32>
    %141 = vector.multi_reduction <add>, %140, %cst_78 [1] : vector<8x8xf32> to vector<8xf32>
    %142 = vector.shape_cast %141 : vector<8xf32> to vector<8x1xf32>
    %143 = tpu.reciprocal %142 {approx = true} : vector<8x1xf32> -> vector<8x1xf32>
    %144 = vector.broadcast %143 : vector<8x1xf32> to vector<8x8xf32>
    %145 = arith.mulf %140, %144 : vector<8x8xf32>
    %cst_79 = arith.constant dense<0.000000e+00> : vector<8x8xf32>
    %146 = tpu.matmul %145, %132, %cst_79 {dimension_numbers = #tpu.dot_dimension_numbers<[1], [0], [0], [1], [0, 0, 1, 1], [], []>} : vector<8x8xf32>, vector<8x8xf32>, vector<8x8xf32> -> vector<8x8xf32>
    %147 = vector.extract_strided_slice %27 {offsets = [24, 0], sizes = [8, 32], strides = [1, 1]} : vector<32x32xf32> to vector<8x32xf32>
    %cst_80 = arith.constant dense<0.000000e+00> : vector<8x32xf32>
    %148 = tpu.matmul %146, %147, %cst_80 {dimension_numbers = #tpu.dot_dimension_numbers<[1], [0], [0], [1], [0, 0, 1, 1], [], []>} : vector<8x8xf32>, vector<8x32xf32>, vector<8x32xf32> -> vector<8x32xf32>
    %149 = arith.addf %129, %148 : vector<8x32xf32>
    %150 = vector.extract_strided_slice %59 {offsets = [8, 0], sizes = [8, 32], strides = [1, 1]} : vector<16x32xf32> to vector<8x32xf32>
    %151 = vector.extract_strided_slice %62 {offsets = [8, 0], sizes = [8, 32], strides = [1, 1]} : vector<16x32xf32> to vector<8x32xf32>
    %152 = vector.extract_strided_slice %65 {offsets = [8, 0], sizes = [8, 32], strides = [1, 1]} : vector<16x32xf32> to vector<8x32xf32>
    %cst_81 = arith.constant 0.000000e+00 : f32
    %153 = vector.broadcast %cst_81 : f32 to vector<8x32xf32>
    %154 = vector.extract_strided_slice %150 {offsets = [0, 0], sizes = [8, 8], strides = [1, 1]} : vector<8x32xf32> to vector<8x8xf32>
    %155 = vector.extract_strided_slice %151 {offsets = [0, 0], sizes = [8, 8], strides = [1, 1]} : vector<8x32xf32> to vector<8x8xf32>
    %156 = vector.extract_strided_slice %152 {offsets = [0, 0], sizes = [8, 8], strides = [1, 1]} : vector<8x32xf32> to vector<8x8xf32>
    %cst_82 = arith.constant dense<0.000000e+00> : vector<8x8xf32>
    %157 = tpu.matmul %154, %155, %cst_82 {dimension_numbers = #tpu.dot_dimension_numbers<[1], [1], [0], [0], [0, 0, 1, 0], [], []>} : vector<8x8xf32>, vector<8x8xf32>, vector<8x8xf32> -> vector<8x8xf32>
    %cst_83 = arith.constant 0.353553385 : f32
    %158 = vector.broadcast %cst_83 : f32 to vector<8x8xf32>
    %159 = arith.mulf %157, %158 : vector<8x8xf32>
    %cst_84 = arith.constant dense<0xFF800000> : vector<8xf32>
    %160 = vector.multi_reduction <maximumf>, %159, %cst_84 [1] : vector<8x8xf32> to vector<8xf32>
    %161 = vector.shape_cast %160 : vector<8xf32> to vector<8x1xf32>
    %162 = vector.broadcast %161 : vector<8x1xf32> to vector<8x8xf32>
    %163 = arith.subf %159, %162 : vector<8x8xf32>
    %164 = math.exp %163 : vector<8x8xf32>
    %cst_85 = arith.constant dense<0.000000e+00> : vector<8xf32>
    %165 = vector.multi_reduction <add>, %164, %cst_85 [1] : vector<8x8xf32> to vector<8xf32>
    %166 = vector.shape_cast %165 : vector<8xf32> to vector<8x1xf32>
    %167 = tpu.reciprocal %166 {approx = true} : vector<8x1xf32> -> vector<8x1xf32>
    %168 = vector.broadcast %167 : vector<8x1xf32> to vector<8x8xf32>
    %169 = arith.mulf %164, %168 : vector<8x8xf32>
    %cst_86 = arith.constant dense<0.000000e+00> : vector<8x8xf32>
    %170 = tpu.matmul %169, %156, %cst_86 {dimension_numbers = #tpu.dot_dimension_numbers<[1], [0], [0], [1], [0, 0, 1, 1], [], []>} : vector<8x8xf32>, vector<8x8xf32>, vector<8x8xf32> -> vector<8x8xf32>
    %171 = vector.extract_strided_slice %27 {offsets = [0, 0], sizes = [8, 32], strides = [1, 1]} : vector<32x32xf32> to vector<8x32xf32>
    %cst_87 = arith.constant dense<0.000000e+00> : vector<8x32xf32>
    %172 = tpu.matmul %170, %171, %cst_87 {dimension_numbers = #tpu.dot_dimension_numbers<[1], [0], [0], [1], [0, 0, 1, 1], [], []>} : vector<8x8xf32>, vector<8x32xf32>, vector<8x32xf32> -> vector<8x32xf32>
    %173 = arith.addf %153, %172 : vector<8x32xf32>
    %174 = vector.extract_strided_slice %150 {offsets = [0, 8], sizes = [8, 8], strides = [1, 1]} : vector<8x32xf32> to vector<8x8xf32>
    %175 = vector.extract_strided_slice %151 {offsets = [0, 8], sizes = [8, 8], strides = [1, 1]} : vector<8x32xf32> to vector<8x8xf32>
    %176 = vector.extract_strided_slice %152 {offsets = [0, 8], sizes = [8, 8], strides = [1, 1]} : vector<8x32xf32> to vector<8x8xf32>
    %cst_88 = arith.constant dense<0.000000e+00> : vector<8x8xf32>
    %177 = tpu.matmul %174, %175, %cst_88 {dimension_numbers = #tpu.dot_dimension_numbers<[1], [1], [0], [0], [0, 0, 1, 0], [], []>} : vector<8x8xf32>, vector<8x8xf32>, vector<8x8xf32> -> vector<8x8xf32>
    %cst_89 = arith.constant 0.353553385 : f32
    %178 = vector.broadcast %cst_89 : f32 to vector<8x8xf32>
    %179 = arith.mulf %177, %178 : vector<8x8xf32>
    %cst_90 = arith.constant dense<0xFF800000> : vector<8xf32>
    %180 = vector.multi_reduction <maximumf>, %179, %cst_90 [1] : vector<8x8xf32> to vector<8xf32>
    %181 = vector.shape_cast %180 : vector<8xf32> to vector<8x1xf32>
    %182 = vector.broadcast %181 : vector<8x1xf32> to vector<8x8xf32>
    %183 = arith.subf %179, %182 : vector<8x8xf32>
    %184 = math.exp %183 : vector<8x8xf32>
    %cst_91 = arith.constant dense<0.000000e+00> : vector<8xf32>
    %185 = vector.multi_reduction <add>, %184, %cst_91 [1] : vector<8x8xf32> to vector<8xf32>
    %186 = vector.shape_cast %185 : vector<8xf32> to vector<8x1xf32>
    %187 = tpu.reciprocal %186 {approx = true} : vector<8x1xf32> -> vector<8x1xf32>
    %188 = vector.broadcast %187 : vector<8x1xf32> to vector<8x8xf32>
    %189 = arith.mulf %184, %188 : vector<8x8xf32>
    %cst_92 = arith.constant dense<0.000000e+00> : vector<8x8xf32>
    %190 = tpu.matmul %189, %176, %cst_92 {dimension_numbers = #tpu.dot_dimension_numbers<[1], [0], [0], [1], [0, 0, 1, 1], [], []>} : vector<8x8xf32>, vector<8x8xf32>, vector<8x8xf32> -> vector<8x8xf32>
    %191 = vector.extract_strided_slice %27 {offsets = [8, 0], sizes = [8, 32], strides = [1, 1]} : vector<32x32xf32> to vector<8x32xf32>
    %cst_93 = arith.constant dense<0.000000e+00> : vector<8x32xf32>
    %192 = tpu.matmul %190, %191, %cst_93 {dimension_numbers = #tpu.dot_dimension_numbers<[1], [0], [0], [1], [0, 0, 1, 1], [], []>} : vector<8x8xf32>, vector<8x32xf32>, vector<8x32xf32> -> vector<8x32xf32>
    %193 = arith.addf %173, %192 : vector<8x32xf32>
    %194 = vector.extract_strided_slice %150 {offsets = [0, 16], sizes = [8, 8], strides = [1, 1]} : vector<8x32xf32> to vector<8x8xf32>
    %195 = vector.extract_strided_slice %151 {offsets = [0, 16], sizes = [8, 8], strides = [1, 1]} : vector<8x32xf32> to vector<8x8xf32>
    %196 = vector.extract_strided_slice %152 {offsets = [0, 16], sizes = [8, 8], strides = [1, 1]} : vector<8x32xf32> to vector<8x8xf32>
    %cst_94 = arith.constant dense<0.000000e+00> : vector<8x8xf32>
    %197 = tpu.matmul %194, %195, %cst_94 {dimension_numbers = #tpu.dot_dimension_numbers<[1], [1], [0], [0], [0, 0, 1, 0], [], []>} : vector<8x8xf32>, vector<8x8xf32>, vector<8x8xf32> -> vector<8x8xf32>
    %cst_95 = arith.constant 0.353553385 : f32
    %198 = vector.broadcast %cst_95 : f32 to vector<8x8xf32>
    %199 = arith.mulf %197, %198 : vector<8x8xf32>
    %cst_96 = arith.constant dense<0xFF800000> : vector<8xf32>
    %200 = vector.multi_reduction <maximumf>, %199, %cst_96 [1] : vector<8x8xf32> to vector<8xf32>
    %201 = vector.shape_cast %200 : vector<8xf32> to vector<8x1xf32>
    %202 = vector.broadcast %201 : vector<8x1xf32> to vector<8x8xf32>
    %203 = arith.subf %199, %202 : vector<8x8xf32>
    %204 = math.exp %203 : vector<8x8xf32>
    %cst_97 = arith.constant dense<0.000000e+00> : vector<8xf32>
    %205 = vector.multi_reduction <add>, %204, %cst_97 [1] : vector<8x8xf32> to vector<8xf32>
    %206 = vector.shape_cast %205 : vector<8xf32> to vector<8x1xf32>
    %207 = tpu.reciprocal %206 {approx = true} : vector<8x1xf32> -> vector<8x1xf32>
    %208 = vector.broadcast %207 : vector<8x1xf32> to vector<8x8xf32>
    %209 = arith.mulf %204, %208 : vector<8x8xf32>
    %cst_98 = arith.constant dense<0.000000e+00> : vector<8x8xf32>
    %210 = tpu.matmul %209, %196, %cst_98 {dimension_numbers = #tpu.dot_dimension_numbers<[1], [0], [0], [1], [0, 0, 1, 1], [], []>} : vector<8x8xf32>, vector<8x8xf32>, vector<8x8xf32> -> vector<8x8xf32>
    %211 = vector.extract_strided_slice %27 {offsets = [16, 0], sizes = [8, 32], strides = [1, 1]} : vector<32x32xf32> to vector<8x32xf32>
    %cst_99 = arith.constant dense<0.000000e+00> : vector<8x32xf32>
    %212 = tpu.matmul %210, %211, %cst_99 {dimension_numbers = #tpu.dot_dimension_numbers<[1], [0], [0], [1], [0, 0, 1, 1], [], []>} : vector<8x8xf32>, vector<8x32xf32>, vector<8x32xf32> -> vector<8x32xf32>
    %213 = arith.addf %193, %212 : vector<8x32xf32>
    %214 = vector.extract_strided_slice %150 {offsets = [0, 24], sizes = [8, 8], strides = [1, 1]} : vector<8x32xf32> to vector<8x8xf32>
    %215 = vector.extract_strided_slice %151 {offsets = [0, 24], sizes = [8, 8], strides = [1, 1]} : vector<8x32xf32> to vector<8x8xf32>
    %216 = vector.extract_strided_slice %152 {offsets = [0, 24], sizes = [8, 8], strides = [1, 1]} : vector<8x32xf32> to vector<8x8xf32>
    %cst_100 = arith.constant dense<0.000000e+00> : vector<8x8xf32>
    %217 = tpu.matmul %214, %215, %cst_100 {dimension_numbers = #tpu.dot_dimension_numbers<[1], [1], [0], [0], [0, 0, 1, 0], [], []>} : vector<8x8xf32>, vector<8x8xf32>, vector<8x8xf32> -> vector<8x8xf32>
    %cst_101 = arith.constant 0.353553385 : f32
    %218 = vector.broadcast %cst_101 : f32 to vector<8x8xf32>
    %219 = arith.mulf %217, %218 : vector<8x8xf32>
    %cst_102 = arith.constant dense<0xFF800000> : vector<8xf32>
    %220 = vector.multi_reduction <maximumf>, %219, %cst_102 [1] : vector<8x8xf32> to vector<8xf32>
    %221 = vector.shape_cast %220 : vector<8xf32> to vector<8x1xf32>
    %222 = vector.broadcast %221 : vector<8x1xf32> to vector<8x8xf32>
    %223 = arith.subf %219, %222 : vector<8x8xf32>
    %224 = math.exp %223 : vector<8x8xf32>
    %cst_103 = arith.constant dense<0.000000e+00> : vector<8xf32>
    %225 = vector.multi_reduction <add>, %224, %cst_103 [1] : vector<8x8xf32> to vector<8xf32>
    %226 = vector.shape_cast %225 : vector<8xf32> to vector<8x1xf32>
    %227 = tpu.reciprocal %226 {approx = true} : vector<8x1xf32> -> vector<8x1xf32>
    %228 = vector.broadcast %227 : vector<8x1xf32> to vector<8x8xf32>
    %229 = arith.mulf %224, %228 : vector<8x8xf32>
    %cst_104 = arith.constant dense<0.000000e+00> : vector<8x8xf32>
    %230 = tpu.matmul %229, %216, %cst_104 {dimension_numbers = #tpu.dot_dimension_numbers<[1], [0], [0], [1], [0, 0, 1, 1], [], []>} : vector<8x8xf32>, vector<8x8xf32>, vector<8x8xf32> -> vector<8x8xf32>
    %231 = vector.extract_strided_slice %27 {offsets = [24, 0], sizes = [8, 32], strides = [1, 1]} : vector<32x32xf32> to vector<8x32xf32>
    %cst_105 = arith.constant dense<0.000000e+00> : vector<8x32xf32>
    %232 = tpu.matmul %230, %231, %cst_105 {dimension_numbers = #tpu.dot_dimension_numbers<[1], [0], [0], [1], [0, 0, 1, 1], [], []>} : vector<8x8xf32>, vector<8x32xf32>, vector<8x32xf32> -> vector<8x32xf32>
    %233 = arith.addf %213, %232 : vector<8x32xf32>
    %234 = tpu.concatenate %149, %233 in 0 : vector<8x32xf32>, vector<8x32xf32> -> vector<16x32xf32>
    %235 = vector.broadcast %11 : vector<1x32xf32> to vector<16x32xf32>
    %236 = arith.addf %234, %235 : vector<16x32xf32>
    %237 = arith.addf %0, %236 : vector<16x32xf32>
    %cst_106 = arith.constant dense<0.000000e+00> : vector<16xf32>
    %238 = vector.multi_reduction <add>, %237, %cst_106 [1] : vector<16x32xf32> to vector<16xf32>
    %239 = vector.shape_cast %238 : vector<16xf32> to vector<16x1xf32>
    %cst_107 = arith.constant 3.200000e+01 : f32
    %240 = vector.broadcast %cst_107 : f32 to vector<16x1xf32>
    %241 = arith.divf %239, %240 : vector<16x1xf32>
    %242 = vector.broadcast %241 : vector<16x1xf32> to vector<16x32xf32>
    %243 = arith.subf %237, %242 : vector<16x32xf32>
    %244 = arith.mulf %243, %243 : vector<16x32xf32>
    %cst_108 = arith.constant dense<0.000000e+00> : vector<16xf32>
    %245 = vector.multi_reduction <add>, %244, %cst_108 [1] : vector<16x32xf32> to vector<16xf32>
    %246 = vector.shape_cast %245 : vector<16xf32> to vector<16x1xf32>
    %cst_109 = arith.constant 0.0322580636 : f32
    %247 = vector.broadcast %cst_109 : f32 to vector<16x1xf32>
    %248 = arith.mulf %246, %247 : vector<16x1xf32>
    %249 = math.sqrt %248 : vector<16x1xf32>
    %cst_110 = arith.constant 9.99999997E-7 : f32
    %250 = vector.broadcast %cst_110 : f32 to vector<16x1xf32>
    %251 = arith.addf %249, %250 : vector<16x1xf32>
    %252 = tpu.reciprocal %251 {approx = true} : vector<16x1xf32> -> vector<16x1xf32>
    %253 = vector.broadcast %252 : vector<16x1xf32> to vector<16x32xf32>
    %254 = arith.mulf %243, %253 : vector<16x32xf32>
    %255 = vector.broadcast %4 : vector<1x32xf32> to vector<16x32xf32>
    %256 = arith.mulf %255, %254 : vector<16x32xf32>
    %257 = vector.broadcast %5 : vector<1x32xf32> to vector<16x32xf32>
    %258 = arith.addf %256, %257 : vector<16x32xf32>
    %cst_111 = arith.constant dense<0.000000e+00> : vector<16x32xf32>
    %259 = tpu.matmul %258, %29, %cst_111 {dimension_numbers = #tpu.dot_dimension_numbers<[1], [0], [0], [1], [0, 0, 1, 1], [], []>} : vector<16x32xf32>, vector<32x32xf32>, vector<16x32xf32> -> vector<16x32xf32>
    %260 = vector.broadcast %12 : vector<1x32xf32> to vector<16x32xf32>
    %261 = arith.addf %259, %260 : vector<16x32xf32>
    %cst_112 = arith.constant dense<0.000000e+00> : vector<16x32xf32>
    %262 = tpu.matmul %1, %31, %cst_112 {dimension_numbers = #tpu.dot_dimension_numbers<[1], [0], [0], [1], [0, 0, 1, 1], [], []>} : vector<16x32xf32>, vector<32x32xf32>, vector<16x32xf32> -> vector<16x32xf32>
    %263 = vector.broadcast %13 : vector<1x32xf32> to vector<16x32xf32>
    %264 = arith.addf %262, %263 : vector<16x32xf32>
    %cst_113 = arith.constant dense<0.000000e+00> : vector<16x32xf32>
    %265 = tpu.matmul %1, %33, %cst_113 {dimension_numbers = #tpu.dot_dimension_numbers<[1], [0], [0], [1], [0, 0, 1, 1], [], []>} : vector<16x32xf32>, vector<32x32xf32>, vector<16x32xf32> -> vector<16x32xf32>
    %266 = vector.broadcast %14 : vector<1x32xf32> to vector<16x32xf32>
    %267 = arith.addf %265, %266 : vector<16x32xf32>
    %268 = vector.extract_strided_slice %261 {offsets = [0, 0], sizes = [8, 32], strides = [1, 1]} : vector<16x32xf32> to vector<8x32xf32>
    %269 = vector.extract_strided_slice %264 {offsets = [0, 0], sizes = [8, 32], strides = [1, 1]} : vector<16x32xf32> to vector<8x32xf32>
    %270 = vector.extract_strided_slice %267 {offsets = [0, 0], sizes = [8, 32], strides = [1, 1]} : vector<16x32xf32> to vector<8x32xf32>
    %cst_114 = arith.constant 0.000000e+00 : f32
    %271 = vector.broadcast %cst_114 : f32 to vector<8x32xf32>
    %272 = vector.extract_strided_slice %268 {offsets = [0, 0], sizes = [8, 8], strides = [1, 1]} : vector<8x32xf32> to vector<8x8xf32>
    %273 = vector.extract_strided_slice %269 {offsets = [0, 0], sizes = [8, 8], strides = [1, 1]} : vector<8x32xf32> to vector<8x8xf32>
    %274 = vector.extract_strided_slice %270 {offsets = [0, 0], sizes = [8, 8], strides = [1, 1]} : vector<8x32xf32> to vector<8x8xf32>
    %cst_115 = arith.constant dense<0.000000e+00> : vector<8x8xf32>
    %275 = tpu.matmul %272, %273, %cst_115 {dimension_numbers = #tpu.dot_dimension_numbers<[1], [1], [0], [0], [0, 0, 1, 0], [], []>} : vector<8x8xf32>, vector<8x8xf32>, vector<8x8xf32> -> vector<8x8xf32>
    %cst_116 = arith.constant 0.353553385 : f32
    %276 = vector.broadcast %cst_116 : f32 to vector<8x8xf32>
    %277 = arith.mulf %275, %276 : vector<8x8xf32>
    %cst_117 = arith.constant dense<0xFF800000> : vector<8xf32>
    %278 = vector.multi_reduction <maximumf>, %277, %cst_117 [1] : vector<8x8xf32> to vector<8xf32>
    %279 = vector.shape_cast %278 : vector<8xf32> to vector<8x1xf32>
    %280 = vector.broadcast %279 : vector<8x1xf32> to vector<8x8xf32>
    %281 = arith.subf %277, %280 : vector<8x8xf32>
    %282 = math.exp %281 : vector<8x8xf32>
    %cst_118 = arith.constant dense<0.000000e+00> : vector<8xf32>
    %283 = vector.multi_reduction <add>, %282, %cst_118 [1] : vector<8x8xf32> to vector<8xf32>
    %284 = vector.shape_cast %283 : vector<8xf32> to vector<8x1xf32>
    %285 = tpu.reciprocal %284 {approx = true} : vector<8x1xf32> -> vector<8x1xf32>
    %286 = vector.broadcast %285 : vector<8x1xf32> to vector<8x8xf32>
    %287 = arith.mulf %282, %286 : vector<8x8xf32>
    %cst_119 = arith.constant dense<0.000000e+00> : vector<8x8xf32>
    %288 = tpu.matmul %287, %274, %cst_119 {dimension_numbers = #tpu.dot_dimension_numbers<[1], [0], [0], [1], [0, 0, 1, 1], [], []>} : vector<8x8xf32>, vector<8x8xf32>, vector<8x8xf32> -> vector<8x8xf32>
    %289 = vector.extract_strided_slice %35 {offsets = [0, 0], sizes = [8, 32], strides = [1, 1]} : vector<32x32xf32> to vector<8x32xf32>
    %cst_120 = arith.constant dense<0.000000e+00> : vector<8x32xf32>
    %290 = tpu.matmul %288, %289, %cst_120 {dimension_numbers = #tpu.dot_dimension_numbers<[1], [0], [0], [1], [0, 0, 1, 1], [], []>} : vector<8x8xf32>, vector<8x32xf32>, vector<8x32xf32> -> vector<8x32xf32>
    %291 = arith.addf %271, %290 : vector<8x32xf32>
    %292 = vector.extract_strided_slice %268 {offsets = [0, 8], sizes = [8, 8], strides = [1, 1]} : vector<8x32xf32> to vector<8x8xf32>
    %293 = vector.extract_strided_slice %269 {offsets = [0, 8], sizes = [8, 8], strides = [1, 1]} : vector<8x32xf32> to vector<8x8xf32>
    %294 = vector.extract_strided_slice %270 {offsets = [0, 8], sizes = [8, 8], strides = [1, 1]} : vector<8x32xf32> to vector<8x8xf32>
    %cst_121 = arith.constant dense<0.000000e+00> : vector<8x8xf32>
    %295 = tpu.matmul %292, %293, %cst_121 {dimension_numbers = #tpu.dot_dimension_numbers<[1], [1], [0], [0], [0, 0, 1, 0], [], []>} : vector<8x8xf32>, vector<8x8xf32>, vector<8x8xf32> -> vector<8x8xf32>
    %cst_122 = arith.constant 0.353553385 : f32
    %296 = vector.broadcast %cst_122 : f32 to vector<8x8xf32>
    %297 = arith.mulf %295, %296 : vector<8x8xf32>
    %cst_123 = arith.constant dense<0xFF800000> : vector<8xf32>
    %298 = vector.multi_reduction <maximumf>, %297, %cst_123 [1] : vector<8x8xf32> to vector<8xf32>
    %299 = vector.shape_cast %298 : vector<8xf32> to vector<8x1xf32>
    %300 = vector.broadcast %299 : vector<8x1xf32> to vector<8x8xf32>
    %301 = arith.subf %297, %300 : vector<8x8xf32>
    %302 = math.exp %301 : vector<8x8xf32>
    %cst_124 = arith.constant dense<0.000000e+00> : vector<8xf32>
    %303 = vector.multi_reduction <add>, %302, %cst_124 [1] : vector<8x8xf32> to vector<8xf32>
    %304 = vector.shape_cast %303 : vector<8xf32> to vector<8x1xf32>
    %305 = tpu.reciprocal %304 {approx = true} : vector<8x1xf32> -> vector<8x1xf32>
    %306 = vector.broadcast %305 : vector<8x1xf32> to vector<8x8xf32>
    %307 = arith.mulf %302, %306 : vector<8x8xf32>
    %cst_125 = arith.constant dense<0.000000e+00> : vector<8x8xf32>
    %308 = tpu.matmul %307, %294, %cst_125 {dimension_numbers = #tpu.dot_dimension_numbers<[1], [0], [0], [1], [0, 0, 1, 1], [], []>} : vector<8x8xf32>, vector<8x8xf32>, vector<8x8xf32> -> vector<8x8xf32>
    %309 = vector.extract_strided_slice %35 {offsets = [8, 0], sizes = [8, 32], strides = [1, 1]} : vector<32x32xf32> to vector<8x32xf32>
    %cst_126 = arith.constant dense<0.000000e+00> : vector<8x32xf32>
    %310 = tpu.matmul %308, %309, %cst_126 {dimension_numbers = #tpu.dot_dimension_numbers<[1], [0], [0], [1], [0, 0, 1, 1], [], []>} : vector<8x8xf32>, vector<8x32xf32>, vector<8x32xf32> -> vector<8x32xf32>
    %311 = arith.addf %291, %310 : vector<8x32xf32>
    %312 = vector.extract_strided_slice %268 {offsets = [0, 16], sizes = [8, 8], strides = [1, 1]} : vector<8x32xf32> to vector<8x8xf32>
    %313 = vector.extract_strided_slice %269 {offsets = [0, 16], sizes = [8, 8], strides = [1, 1]} : vector<8x32xf32> to vector<8x8xf32>
    %314 = vector.extract_strided_slice %270 {offsets = [0, 16], sizes = [8, 8], strides = [1, 1]} : vector<8x32xf32> to vector<8x8xf32>
    %cst_127 = arith.constant dense<0.000000e+00> : vector<8x8xf32>
    %315 = tpu.matmul %312, %313, %cst_127 {dimension_numbers = #tpu.dot_dimension_numbers<[1], [1], [0], [0], [0, 0, 1, 0], [], []>} : vector<8x8xf32>, vector<8x8xf32>, vector<8x8xf32> -> vector<8x8xf32>
    %cst_128 = arith.constant 0.353553385 : f32
    %316 = vector.broadcast %cst_128 : f32 to vector<8x8xf32>
    %317 = arith.mulf %315, %316 : vector<8x8xf32>
    %cst_129 = arith.constant dense<0xFF800000> : vector<8xf32>
    %318 = vector.multi_reduction <maximumf>, %317, %cst_129 [1] : vector<8x8xf32> to vector<8xf32>
    %319 = vector.shape_cast %318 : vector<8xf32> to vector<8x1xf32>
    %320 = vector.broadcast %319 : vector<8x1xf32> to vector<8x8xf32>
    %321 = arith.subf %317, %320 : vector<8x8xf32>
    %322 = math.exp %321 : vector<8x8xf32>
    %cst_130 = arith.constant dense<0.000000e+00> : vector<8xf32>
    %323 = vector.multi_reduction <add>, %322, %cst_130 [1] : vector<8x8xf32> to vector<8xf32>
    %324 = vector.shape_cast %323 : vector<8xf32> to vector<8x1xf32>
    %325 = tpu.reciprocal %324 {approx = true} : vector<8x1xf32> -> vector<8x1xf32>
    %326 = vector.broadcast %325 : vector<8x1xf32> to vector<8x8xf32>
    %327 = arith.mulf %322, %326 : vector<8x8xf32>
    %cst_131 = arith.constant dense<0.000000e+00> : vector<8x8xf32>
    %328 = tpu.matmul %327, %314, %cst_131 {dimension_numbers = #tpu.dot_dimension_numbers<[1], [0], [0], [1], [0, 0, 1, 1], [], []>} : vector<8x8xf32>, vector<8x8xf32>, vector<8x8xf32> -> vector<8x8xf32>
    %329 = vector.extract_strided_slice %35 {offsets = [16, 0], sizes = [8, 32], strides = [1, 1]} : vector<32x32xf32> to vector<8x32xf32>
    %cst_132 = arith.constant dense<0.000000e+00> : vector<8x32xf32>
    %330 = tpu.matmul %328, %329, %cst_132 {dimension_numbers = #tpu.dot_dimension_numbers<[1], [0], [0], [1], [0, 0, 1, 1], [], []>} : vector<8x8xf32>, vector<8x32xf32>, vector<8x32xf32> -> vector<8x32xf32>
    %331 = arith.addf %311, %330 : vector<8x32xf32>
    %332 = vector.extract_strided_slice %268 {offsets = [0, 24], sizes = [8, 8], strides = [1, 1]} : vector<8x32xf32> to vector<8x8xf32>
    %333 = vector.extract_strided_slice %269 {offsets = [0, 24], sizes = [8, 8], strides = [1, 1]} : vector<8x32xf32> to vector<8x8xf32>
    %334 = vector.extract_strided_slice %270 {offsets = [0, 24], sizes = [8, 8], strides = [1, 1]} : vector<8x32xf32> to vector<8x8xf32>
    %cst_133 = arith.constant dense<0.000000e+00> : vector<8x8xf32>
    %335 = tpu.matmul %332, %333, %cst_133 {dimension_numbers = #tpu.dot_dimension_numbers<[1], [1], [0], [0], [0, 0, 1, 0], [], []>} : vector<8x8xf32>, vector<8x8xf32>, vector<8x8xf32> -> vector<8x8xf32>
    %cst_134 = arith.constant 0.353553385 : f32
    %336 = vector.broadcast %cst_134 : f32 to vector<8x8xf32>
    %337 = arith.mulf %335, %336 : vector<8x8xf32>
    %cst_135 = arith.constant dense<0xFF800000> : vector<8xf32>
    %338 = vector.multi_reduction <maximumf>, %337, %cst_135 [1] : vector<8x8xf32> to vector<8xf32>
    %339 = vector.shape_cast %338 : vector<8xf32> to vector<8x1xf32>
    %340 = vector.broadcast %339 : vector<8x1xf32> to vector<8x8xf32>
    %341 = arith.subf %337, %340 : vector<8x8xf32>
    %342 = math.exp %341 : vector<8x8xf32>
    %cst_136 = arith.constant dense<0.000000e+00> : vector<8xf32>
    %343 = vector.multi_reduction <add>, %342, %cst_136 [1] : vector<8x8xf32> to vector<8xf32>
    %344 = vector.shape_cast %343 : vector<8xf32> to vector<8x1xf32>
    %345 = tpu.reciprocal %344 {approx = true} : vector<8x1xf32> -> vector<8x1xf32>
    %346 = vector.broadcast %345 : vector<8x1xf32> to vector<8x8xf32>
    %347 = arith.mulf %342, %346 : vector<8x8xf32>
    %cst_137 = arith.constant dense<0.000000e+00> : vector<8x8xf32>
    %348 = tpu.matmul %347, %334, %cst_137 {dimension_numbers = #tpu.dot_dimension_numbers<[1], [0], [0], [1], [0, 0, 1, 1], [], []>} : vector<8x8xf32>, vector<8x8xf32>, vector<8x8xf32> -> vector<8x8xf32>
    %349 = vector.extract_strided_slice %35 {offsets = [24, 0], sizes = [8, 32], strides = [1, 1]} : vector<32x32xf32> to vector<8x32xf32>
    %cst_138 = arith.constant dense<0.000000e+00> : vector<8x32xf32>
    %350 = tpu.matmul %348, %349, %cst_138 {dimension_numbers = #tpu.dot_dimension_numbers<[1], [0], [0], [1], [0, 0, 1, 1], [], []>} : vector<8x8xf32>, vector<8x32xf32>, vector<8x32xf32> -> vector<8x32xf32>
    %351 = arith.addf %331, %350 : vector<8x32xf32>
    %352 = vector.extract_strided_slice %261 {offsets = [8, 0], sizes = [8, 32], strides = [1, 1]} : vector<16x32xf32> to vector<8x32xf32>
    %353 = vector.extract_strided_slice %264 {offsets = [8, 0], sizes = [8, 32], strides = [1, 1]} : vector<16x32xf32> to vector<8x32xf32>
    %354 = vector.extract_strided_slice %267 {offsets = [8, 0], sizes = [8, 32], strides = [1, 1]} : vector<16x32xf32> to vector<8x32xf32>
    %cst_139 = arith.constant 0.000000e+00 : f32
    %355 = vector.broadcast %cst_139 : f32 to vector<8x32xf32>
    %356 = vector.extract_strided_slice %352 {offsets = [0, 0], sizes = [8, 8], strides = [1, 1]} : vector<8x32xf32> to vector<8x8xf32>
    %357 = vector.extract_strided_slice %353 {offsets = [0, 0], sizes = [8, 8], strides = [1, 1]} : vector<8x32xf32> to vector<8x8xf32>
    %358 = vector.extract_strided_slice %354 {offsets = [0, 0], sizes = [8, 8], strides = [1, 1]} : vector<8x32xf32> to vector<8x8xf32>
    %cst_140 = arith.constant dense<0.000000e+00> : vector<8x8xf32>
    %359 = tpu.matmul %356, %357, %cst_140 {dimension_numbers = #tpu.dot_dimension_numbers<[1], [1], [0], [0], [0, 0, 1, 0], [], []>} : vector<8x8xf32>, vector<8x8xf32>, vector<8x8xf32> -> vector<8x8xf32>
    %cst_141 = arith.constant 0.353553385 : f32
    %360 = vector.broadcast %cst_141 : f32 to vector<8x8xf32>
    %361 = arith.mulf %359, %360 : vector<8x8xf32>
    %cst_142 = arith.constant dense<0xFF800000> : vector<8xf32>
    %362 = vector.multi_reduction <maximumf>, %361, %cst_142 [1] : vector<8x8xf32> to vector<8xf32>
    %363 = vector.shape_cast %362 : vector<8xf32> to vector<8x1xf32>
    %364 = vector.broadcast %363 : vector<8x1xf32> to vector<8x8xf32>
    %365 = arith.subf %361, %364 : vector<8x8xf32>
    %366 = math.exp %365 : vector<8x8xf32>
    %cst_143 = arith.constant dense<0.000000e+00> : vector<8xf32>
    %367 = vector.multi_reduction <add>, %366, %cst_143 [1] : vector<8x8xf32> to vector<8xf32>
    %368 = vector.shape_cast %367 : vector<8xf32> to vector<8x1xf32>
    %369 = tpu.reciprocal %368 {approx = true} : vector<8x1xf32> -> vector<8x1xf32>
    %370 = vector.broadcast %369 : vector<8x1xf32> to vector<8x8xf32>
    %371 = arith.mulf %366, %370 : vector<8x8xf32>
    %cst_144 = arith.constant dense<0.000000e+00> : vector<8x8xf32>
    %372 = tpu.matmul %371, %358, %cst_144 {dimension_numbers = #tpu.dot_dimension_numbers<[1], [0], [0], [1], [0, 0, 1, 1], [], []>} : vector<8x8xf32>, vector<8x8xf32>, vector<8x8xf32> -> vector<8x8xf32>
    %373 = vector.extract_strided_slice %35 {offsets = [0, 0], sizes = [8, 32], strides = [1, 1]} : vector<32x32xf32> to vector<8x32xf32>
    %cst_145 = arith.constant dense<0.000000e+00> : vector<8x32xf32>
    %374 = tpu.matmul %372, %373, %cst_145 {dimension_numbers = #tpu.dot_dimension_numbers<[1], [0], [0], [1], [0, 0, 1, 1], [], []>} : vector<8x8xf32>, vector<8x32xf32>, vector<8x32xf32> -> vector<8x32xf32>
    %375 = arith.addf %355, %374 : vector<8x32xf32>
    %376 = vector.extract_strided_slice %352 {offsets = [0, 8], sizes = [8, 8], strides = [1, 1]} : vector<8x32xf32> to vector<8x8xf32>
    %377 = vector.extract_strided_slice %353 {offsets = [0, 8], sizes = [8, 8], strides = [1, 1]} : vector<8x32xf32> to vector<8x8xf32>
    %378 = vector.extract_strided_slice %354 {offsets = [0, 8], sizes = [8, 8], strides = [1, 1]} : vector<8x32xf32> to vector<8x8xf32>
    %cst_146 = arith.constant dense<0.000000e+00> : vector<8x8xf32>
    %379 = tpu.matmul %376, %377, %cst_146 {dimension_numbers = #tpu.dot_dimension_numbers<[1], [1], [0], [0], [0, 0, 1, 0], [], []>} : vector<8x8xf32>, vector<8x8xf32>, vector<8x8xf32> -> vector<8x8xf32>
    %cst_147 = arith.constant 0.353553385 : f32
    %380 = vector.broadcast %cst_147 : f32 to vector<8x8xf32>
    %381 = arith.mulf %379, %380 : vector<8x8xf32>
    %cst_148 = arith.constant dense<0xFF800000> : vector<8xf32>
    %382 = vector.multi_reduction <maximumf>, %381, %cst_148 [1] : vector<8x8xf32> to vector<8xf32>
    %383 = vector.shape_cast %382 : vector<8xf32> to vector<8x1xf32>
    %384 = vector.broadcast %383 : vector<8x1xf32> to vector<8x8xf32>
    %385 = arith.subf %381, %384 : vector<8x8xf32>
    %386 = math.exp %385 : vector<8x8xf32>
    %cst_149 = arith.constant dense<0.000000e+00> : vector<8xf32>
    %387 = vector.multi_reduction <add>, %386, %cst_149 [1] : vector<8x8xf32> to vector<8xf32>
    %388 = vector.shape_cast %387 : vector<8xf32> to vector<8x1xf32>
    %389 = tpu.reciprocal %388 {approx = true} : vector<8x1xf32> -> vector<8x1xf32>
    %390 = vector.broadcast %389 : vector<8x1xf32> to vector<8x8xf32>
    %391 = arith.mulf %386, %390 : vector<8x8xf32>
    %cst_150 = arith.constant dense<0.000000e+00> : vector<8x8xf32>
    %392 = tpu.matmul %391, %378, %cst_150 {dimension_numbers = #tpu.dot_dimension_numbers<[1], [0], [0], [1], [0, 0, 1, 1], [], []>} : vector<8x8xf32>, vector<8x8xf32>, vector<8x8xf32> -> vector<8x8xf32>
    %393 = vector.extract_strided_slice %35 {offsets = [8, 0], sizes = [8, 32], strides = [1, 1]} : vector<32x32xf32> to vector<8x32xf32>
    %cst_151 = arith.constant dense<0.000000e+00> : vector<8x32xf32>
    %394 = tpu.matmul %392, %393, %cst_151 {dimension_numbers = #tpu.dot_dimension_numbers<[1], [0], [0], [1], [0, 0, 1, 1], [], []>} : vector<8x8xf32>, vector<8x32xf32>, vector<8x32xf32> -> vector<8x32xf32>
    %395 = arith.addf %375, %394 : vector<8x32xf32>
    %396 = vector.extract_strided_slice %352 {offsets = [0, 16], sizes = [8, 8], strides = [1, 1]} : vector<8x32xf32> to vector<8x8xf32>
    %397 = vector.extract_strided_slice %353 {offsets = [0, 16], sizes = [8, 8], strides = [1, 1]} : vector<8x32xf32> to vector<8x8xf32>
    %398 = vector.extract_strided_slice %354 {offsets = [0, 16], sizes = [8, 8], strides = [1, 1]} : vector<8x32xf32> to vector<8x8xf32>
    %cst_152 = arith.constant dense<0.000000e+00> : vector<8x8xf32>
    %399 = tpu.matmul %396, %397, %cst_152 {dimension_numbers = #tpu.dot_dimension_numbers<[1], [1], [0], [0], [0, 0, 1, 0], [], []>} : vector<8x8xf32>, vector<8x8xf32>, vector<8x8xf32> -> vector<8x8xf32>
    %cst_153 = arith.constant 0.353553385 : f32
    %400 = vector.broadcast %cst_153 : f32 to vector<8x8xf32>
    %401 = arith.mulf %399, %400 : vector<8x8xf32>
    %cst_154 = arith.constant dense<0xFF800000> : vector<8xf32>
    %402 = vector.multi_reduction <maximumf>, %401, %cst_154 [1] : vector<8x8xf32> to vector<8xf32>
    %403 = vector.shape_cast %402 : vector<8xf32> to vector<8x1xf32>
    %404 = vector.broadcast %403 : vector<8x1xf32> to vector<8x8xf32>
    %405 = arith.subf %401, %404 : vector<8x8xf32>
    %406 = math.exp %405 : vector<8x8xf32>
    %cst_155 = arith.constant dense<0.000000e+00> : vector<8xf32>
    %407 = vector.multi_reduction <add>, %406, %cst_155 [1] : vector<8x8xf32> to vector<8xf32>
    %408 = vector.shape_cast %407 : vector<8xf32> to vector<8x1xf32>
    %409 = tpu.reciprocal %408 {approx = true} : vector<8x1xf32> -> vector<8x1xf32>
    %410 = vector.broadcast %409 : vector<8x1xf32> to vector<8x8xf32>
    %411 = arith.mulf %406, %410 : vector<8x8xf32>
    %cst_156 = arith.constant dense<0.000000e+00> : vector<8x8xf32>
    %412 = tpu.matmul %411, %398, %cst_156 {dimension_numbers = #tpu.dot_dimension_numbers<[1], [0], [0], [1], [0, 0, 1, 1], [], []>} : vector<8x8xf32>, vector<8x8xf32>, vector<8x8xf32> -> vector<8x8xf32>
    %413 = vector.extract_strided_slice %35 {offsets = [16, 0], sizes = [8, 32], strides = [1, 1]} : vector<32x32xf32> to vector<8x32xf32>
    %cst_157 = arith.constant dense<0.000000e+00> : vector<8x32xf32>
    %414 = tpu.matmul %412, %413, %cst_157 {dimension_numbers = #tpu.dot_dimension_numbers<[1], [0], [0], [1], [0, 0, 1, 1], [], []>} : vector<8x8xf32>, vector<8x32xf32>, vector<8x32xf32> -> vector<8x32xf32>
    %415 = arith.addf %395, %414 : vector<8x32xf32>
    %416 = vector.extract_strided_slice %352 {offsets = [0, 24], sizes = [8, 8], strides = [1, 1]} : vector<8x32xf32> to vector<8x8xf32>
    %417 = vector.extract_strided_slice %353 {offsets = [0, 24], sizes = [8, 8], strides = [1, 1]} : vector<8x32xf32> to vector<8x8xf32>
    %418 = vector.extract_strided_slice %354 {offsets = [0, 24], sizes = [8, 8], strides = [1, 1]} : vector<8x32xf32> to vector<8x8xf32>
    %cst_158 = arith.constant dense<0.000000e+00> : vector<8x8xf32>
    %419 = tpu.matmul %416, %417, %cst_158 {dimension_numbers = #tpu.dot_dimension_numbers<[1], [1], [0], [0], [0, 0, 1, 0], [], []>} : vector<8x8xf32>, vector<8x8xf32>, vector<8x8xf32> -> vector<8x8xf32>
    %cst_159 = arith.constant 0.353553385 : f32
    %420 = vector.broadcast %cst_159 : f32 to vector<8x8xf32>
    %421 = arith.mulf %419, %420 : vector<8x8xf32>
    %cst_160 = arith.constant dense<0xFF800000> : vector<8xf32>
    %422 = vector.multi_reduction <maximumf>, %421, %cst_160 [1] : vector<8x8xf32> to vector<8xf32>
    %423 = vector.shape_cast %422 : vector<8xf32> to vector<8x1xf32>
    %424 = vector.broadcast %423 : vector<8x1xf32> to vector<8x8xf32>
    %425 = arith.subf %421, %424 : vector<8x8xf32>
    %426 = math.exp %425 : vector<8x8xf32>
    %cst_161 = arith.constant dense<0.000000e+00> : vector<8xf32>
    %427 = vector.multi_reduction <add>, %426, %cst_161 [1] : vector<8x8xf32> to vector<8xf32>
    %428 = vector.shape_cast %427 : vector<8xf32> to vector<8x1xf32>
    %429 = tpu.reciprocal %428 {approx = true} : vector<8x1xf32> -> vector<8x1xf32>
    %430 = vector.broadcast %429 : vector<8x1xf32> to vector<8x8xf32>
    %431 = arith.mulf %426, %430 : vector<8x8xf32>
    %cst_162 = arith.constant dense<0.000000e+00> : vector<8x8xf32>
    %432 = tpu.matmul %431, %418, %cst_162 {dimension_numbers = #tpu.dot_dimension_numbers<[1], [0], [0], [1], [0, 0, 1, 1], [], []>} : vector<8x8xf32>, vector<8x8xf32>, vector<8x8xf32> -> vector<8x8xf32>
    %433 = vector.extract_strided_slice %35 {offsets = [24, 0], sizes = [8, 32], strides = [1, 1]} : vector<32x32xf32> to vector<8x32xf32>
    %cst_163 = arith.constant dense<0.000000e+00> : vector<8x32xf32>
    %434 = tpu.matmul %432, %433, %cst_163 {dimension_numbers = #tpu.dot_dimension_numbers<[1], [0], [0], [1], [0, 0, 1, 1], [], []>} : vector<8x8xf32>, vector<8x32xf32>, vector<8x32xf32> -> vector<8x32xf32>
    %435 = arith.addf %415, %434 : vector<8x32xf32>
    %436 = tpu.concatenate %351, %435 in 0 : vector<8x32xf32>, vector<8x32xf32> -> vector<16x32xf32>
    %437 = vector.broadcast %15 : vector<1x32xf32> to vector<16x32xf32>
    %438 = arith.addf %436, %437 : vector<16x32xf32>
    %439 = arith.addf %237, %438 : vector<16x32xf32>
    %cst_164 = arith.constant dense<0.000000e+00> : vector<16xf32>
    %440 = vector.multi_reduction <add>, %439, %cst_164 [1] : vector<16x32xf32> to vector<16xf32>
    %441 = vector.shape_cast %440 : vector<16xf32> to vector<16x1xf32>
    %cst_165 = arith.constant 3.200000e+01 : f32
    %442 = vector.broadcast %cst_165 : f32 to vector<16x1xf32>
    %443 = arith.divf %441, %442 : vector<16x1xf32>
    %444 = vector.broadcast %443 : vector<16x1xf32> to vector<16x32xf32>
    %445 = arith.subf %439, %444 : vector<16x32xf32>
    %446 = arith.mulf %445, %445 : vector<16x32xf32>
    %cst_166 = arith.constant dense<0.000000e+00> : vector<16xf32>
    %447 = vector.multi_reduction <add>, %446, %cst_166 [1] : vector<16x32xf32> to vector<16xf32>
    %448 = vector.shape_cast %447 : vector<16xf32> to vector<16x1xf32>
    %cst_167 = arith.constant 0.0322580636 : f32
    %449 = vector.broadcast %cst_167 : f32 to vector<16x1xf32>
    %450 = arith.mulf %448, %449 : vector<16x1xf32>
    %451 = math.sqrt %450 : vector<16x1xf32>
    %cst_168 = arith.constant 9.99999997E-7 : f32
    %452 = vector.broadcast %cst_168 : f32 to vector<16x1xf32>
    %453 = arith.addf %451, %452 : vector<16x1xf32>
    %454 = tpu.reciprocal %453 {approx = true} : vector<16x1xf32> -> vector<16x1xf32>
    %455 = vector.broadcast %454 : vector<16x1xf32> to vector<16x32xf32>
    %456 = arith.mulf %445, %455 : vector<16x32xf32>
    %457 = vector.broadcast %6 : vector<1x32xf32> to vector<16x32xf32>
    %458 = arith.mulf %457, %456 : vector<16x32xf32>
    %459 = vector.broadcast %7 : vector<1x32xf32> to vector<16x32xf32>
    %460 = arith.addf %458, %459 : vector<16x32xf32>
    %cst_169 = arith.constant dense<0.000000e+00> : vector<16x256xf32>
    %461 = tpu.matmul %460, %18, %cst_169 {dimension_numbers = #tpu.dot_dimension_numbers<[1], [0], [0], [1], [0, 0, 1, 1], [], []>} : vector<16x32xf32>, vector<32x256xf32>, vector<16x256xf32> -> vector<16x256xf32>
    %462 = vector.broadcast %17 : vector<1x256xf32> to vector<16x256xf32>
    %463 = arith.addf %461, %462 : vector<16x256xf32>
    %cst_170 = arith.constant 0.000000e+00 : f32
    %464 = vector.broadcast %cst_170 : f32 to vector<16x256xf32>
    %465 = arith.maximumf %463, %464 : vector<16x256xf32>
    %cst_171 = arith.constant dense<0.000000e+00> : vector<16x32xf32>
    %466 = tpu.matmul %465, %19, %cst_171 {dimension_numbers = #tpu.dot_dimension_numbers<[1], [0], [0], [1], [0, 0, 1, 1], [], []>} : vector<16x256xf32>, vector<256x32xf32>, vector<16x32xf32> -> vector<16x32xf32>
    %467 = vector.broadcast %16 : vector<1x32xf32> to vector<16x32xf32>
    %468 = arith.addf %466, %467 : vector<16x32xf32>
    %469 = arith.addf %439, %468 : vector<16x32xf32>
    %c0_172 = arith.constant 0 : index
    %c0_173 = arith.constant 0 : index
    %470 = vector.load %arg8[%c0_172, %c0_173] : memref<16x32xf32, #tpu.memory_space<vmem>>, vector<16x32xf32>
    tpu.vector_store %arg8[%c0_172, %c0_173], %469 {strides = array<i32>} : memref<16x32xf32, #tpu.memory_space<vmem>>, vector<16x32xf32>,
    return
  }
  func.func @transform_0(%arg0: i32) -> (i32, i32) {
    %c0_i32 = arith.constant 0 : i32
    %c0_i32_0 = arith.constant 0 : i32
    %c0_i32_1 = arith.constant 0 : i32
    return %c0_i32, %c0_i32_0 : i32, i32
  }
  func.func @transform_1(%arg0: i32) -> (i32, i32) {
    %c0_i32 = arith.constant 0 : i32
    %c0_i32_0 = arith.constant 0 : i32
    %c0_i32_1 = arith.constant 0 : i32
    return %c0_i32, %c0_i32_0 : i32, i32
  }
  func.func @transform_2(%arg0: i32) -> (i32, i32, i32) {
    %c0_i32 = arith.constant 0 : i32
    %c0_i32_0 = arith.constant 0 : i32
    %c0_i32_1 = arith.constant 0 : i32
    %c0_i32_2 = arith.constant 0 : i32
    return %c0_i32, %c0_i32_0, %c0_i32_1 : i32, i32, i32
  }
  func.func @transform_3(%arg0: i32) -> (i32, i32) {
    %c0_i32 = arith.constant 0 : i32
    %c0_i32_0 = arith.constant 0 : i32
    %c0_i32_1 = arith.constant 0 : i32
    return %c0_i32, %c0_i32_0 : i32, i32
  }
  func.func @transform_4(%arg0: i32) -> (i32, i32) {
    %c0_i32 = arith.constant 0 : i32
    %c0_i32_0 = arith.constant 0 : i32
    %c0_i32_1 = arith.constant 0 : i32
    return %c0_i32, %c0_i32_0 : i32, i32
  }
  func.func @transform_5(%arg0: i32) -> (i32, i32) {
    %c0_i32 = arith.constant 0 : i32
    %c0_i32_0 = arith.constant 0 : i32
    %c0_i32_1 = arith.constant 0 : i32
    return %c0_i32, %c0_i32_0 : i32, i32
  }
  func.func @transform_6(%arg0: i32) -> (i32, i32) {
    %c0_i32 = arith.constant 0 : i32
    %c0_i32_0 = arith.constant 0 : i32
    %c0_i32_1 = arith.constant 0 : i32
    return %c0_i32, %c0_i32_0 : i32, i32
  }
  func.func @transform_7(%arg0: i32) -> (i32, i32) {
    %c0_i32 = arith.constant 0 : i32
    %c0_i32_0 = arith.constant 0 : i32
    %c0_i32_1 = arith.constant 0 : i32
    return %c0_i32, %c0_i32_0 : i32, i32
  }
}

</mosaic_0001>

<bundles_post_ra>
// kernel: tpu_custom_call.1
= control target key start
LH: loop header
LB: loop body
LE: loop exit
PB: predicated region body
PF: predicated region fallthrough
CT: control target
= control target key end

     0   :  { %12 = vsyncpa [#allocation3], 0  ;;  %s6523_s0 = inlined_call_operand.hbm [shape: f32[16,32], index: 0, kind: input, shape index: {}]   ;;  %s6524_s1 = inlined_call_operand.hbm [shape: f32[16,32], index: 1, kind: input, shape index: {}]   ;;  %s6525_s2 = inlined_call_operand.vmem [shape: f32[8,32,32], index: 2, kind: input, shape index: {}]   ;;  %s6526_s3 = inlined_call_operand.hbm [shape: f32[16,32], index: 3, kind: input, shape index: {}]   ;;  %s6527_s4 = inlined_call_operand.vmem [shape: f32[32,256], index: 4, kind: input, shape index: {}]   ;;  %s6528_s5 = inlined_call_operand.vmem [shape: f32[1,256], index: 5, kind: input, shape index: {}]   ;;  %s6529_s6 = inlined_call_operand.vmem [shape: f32[256,32], index: 6, kind: input, shape index: {}]   ;;  %s6530_s7 = inlined_call_operand.hbm [shape: f32[16,32], index: 7, kind: output, shape index: {}]  }
   0x1   :  { %13 = vsyncpa [#allocation6], 0 }
   0x2   :  { %14 = vsyncpa [#allocation4], 0  ;;  %s5727_s24 = smov [#allocation5]   ;;  %s5728_s26 = smov [#allocation2]  }
   0x3   :  { %s32_s25 = sshll.u32 %s5727_s24, 4  ;;  %s20_s27 = sshll.u32 %s5728_s26, 4  ;;  %s33_s25 = int_to_ptr.vmem [resolvable:$true] %s32_s25  ;;  %s5778_s27 = int_to_ptr.vmem [resolvable:$true] %s20_s27 }
   0x4   :  { %s5633_s30 = scalar_lea.hbm %s6524_s1, 256 }
   0x5   :  { %p5634_p0 = scmp.ne.s32.totalorder %s6524_s1, %s5633_s30  ;;  %p5637_p1 = scmp.lt.u32.totalorder %s5633_s30, %s6524_s1 }
   0x7   :  { %p5639_p2 = pnand %p5637_p1, %p5634_p0 }
   0x9   :  { %5642 = shalt.err (!%p5639_p2)
}
   0xa   :  { %s5643_s12 = scalar_lea.vmem %s33_s25, 256  ;;  %p5648_p4 = scmp.lt.s32.totalorder %s33_s25, %s33_s25 }
   0xb   :  { %p5644_p3 = scmp.ne.s32.totalorder %s33_s25, %s5643_s12  ;;  %p5649_p5 = scmp.lt.s32.totalorder %s5643_s12, %s5643_s12 }
   0xd   :  { %p5650_p6 = por %p5649_p5, %p5648_p4 }
   0xf   :  { %p5651_p7 = pnand %p5650_p6, %p5644_p3 }
  0x11   :  { %5654 = shalt.err (!%p5651_p7)
}
  0x12   :  { %s5729_s13 = smov 128   ;;  %s5730_s14 = smov 8  }
  0x13   :  { %38 = dma.hbm_to_vmem [thread:$0]  %s6524_s1, 256, %s33_s25, [#allocation6], %s5729_s13, %s5729_s13, %s5730_s14  }
  0x14   :  { %s5655_s19 = scalar_lea.hbm %s6523_s0, 256 }
  0x15   :  { %p5656_p8 = scmp.ne.s32.totalorder %s6523_s0, %s5655_s19  ;;  %p5659_p9 = scmp.lt.u32.totalorder %s5655_s19, %s6523_s0 }
  0x17   :  { %p5661_p10 = pnand %p5659_p9, %p5656_p8 }
  0x19   :  { %5664 = shalt.err (!%p5661_p10)
}
  0x1a   :  { %s5665_s24 = scalar_lea.vmem %s5778_s27, 256  ;;  %p5670_p12 = scmp.lt.s32.totalorder %s5778_s27, %s5778_s27 }
  0x1b   :  { %p5666_p11 = scmp.ne.s32.totalorder %s5778_s27, %s5665_s24  ;;  %p5671_p13 = scmp.lt.s32.totalorder %s5665_s24, %s5665_s24 }
  0x1d   :  { %p5672_p0 = por %p5671_p13, %p5670_p12 }
  0x1f   :  { %p5673_p1 = pnand %p5672_p0, %p5666_p11 }
  0x21   :  { %5676 = shalt.err (!%p5673_p1)
}
  0x22   :  { %26 = dma.hbm_to_vmem [thread:$0]  %s6523_s0, 256, %s5778_s27, [#allocation3], %s5729_s13, %s5729_s13, %s5730_s14  }
  0x23   :  { %s5731_s26 = smov [#allocation7]   ;;  %s5677_s8 = scalar_lea.hbm %s6526_s3, 256 }
  0x24   :  { %s46_s28 = sshll.u32 %s5731_s26, 4  ;;  %p5678_p2 = scmp.ne.s32.totalorder %s6526_s3, %s5677_s8  ;;  %s47_s28 = int_to_ptr.vmem [resolvable:$true] %s46_s28 }
  0x25   :  { %p5681_p3 = scmp.lt.u32.totalorder %s5677_s8, %s6526_s3 }
  0x27   :  { %p5683_p4 = pnand %p5681_p3, %p5678_p2 }
  0x29   :  { %5686 = shalt.err (!%p5683_p4)
}
  0x2a   :  { %s5687_s15 = scalar_lea.vmem %s47_s28, 256  ;;  %p5692_p6 = scmp.lt.s32.totalorder %s47_s28, %s47_s28 }
  0x2b   :  { %p5688_p5 = scmp.ne.s32.totalorder %s47_s28, %s5687_s15  ;;  %p5693_p7 = scmp.lt.s32.totalorder %s5687_s15, %s5687_s15 }
  0x2d   :  { %p5694_p8 = por %p5693_p7, %p5692_p6 }
  0x2f   :  { %p5695_p9 = pnand %p5694_p8, %p5688_p5 }
  0x31   :  { %5698 = shalt.err (!%p5695_p9)
}
  0x32   :  { %52 = dma.hbm_to_vmem [thread:$0]  %s6526_s3, 256, %s47_s28, [#allocation6], %s5729_s13, %s5729_s13, %s5730_s14  }
  0x33   :  { %5721 = dma.done.wait [#allocation3], 256  }
  0x34   :  { %5722 = vsyncadd [#allocation3], 4294967040 }
  0x35   :  { %5723 = dma.done.wait [#allocation6], 512  }
  0x36   :  { %5724 = vsyncadd [#allocation6], 4294966784  ;;  %vm167_vm0 = vcmask 261120   ;;  %v5830_v0 = vld [vmem:[#allocation2] sm:$0xff]  ;;  %v5832_v1 = vld [vmem:[#allocation2 + $0x8] sm:$0xff]  ;;  %v5732_v58 = vmov 0.0  }
  0x37   :  { %v168_v2 = vsel %vm167_vm0, %v5830_v0, 0.0  ;;  %v171_v3 = vsel %vm167_vm0, %v5832_v1, 0.0  ;;  %v128_v14 = vld [vmem:[%s6525_s2] sm:$0xff]  ;;  %v129_v15 = vld [vmem:[%s6525_s2 + $0x8] sm:$0xff]  ;;  %v130_v16 = vld [vmem:[%s6525_s2 + $0x10] sm:$0xff]  ;;  %5178 = vmatprep.subr.mxu1 %v5732_v58  ;;  %vm5733_vm5 = vmmov 0  }
  0x38   :  { %169 = vadd.xlane.f32.xlu0 %v168_v2  ;;  %v5446_v17 = vpack.c.bf16 %v129_v15, %v128_v14  ;;  %v131_v18 = vld [vmem:[%s6525_s2 + $0x18] sm:$0xff]  ;;  %v4849_v20 = vld [vmem:[%s6525_s2 + $0x20] sm:$0xff]  ;;  %v4850_v21 = vld [vmem:[%s6525_s2 + $0x28] sm:$0xff]  ;;  %5180 = vmatprep.mubr.msk.f32.mxu1 %vm5733_vm5, %v5732_v58  ;;  %s5734_s3 = smov 120   ;;  %vm464_vm6 = vcmask 64512   ;;  %s5735_s16 = smov 112  }
  0x39   :  { %v5450_v19 = vpack.c.bf16 %v131_v18, %v130_v16  ;;  %v5454_v22 = vpack.c.bf16 %v4850_v21, %v4849_v20  ;;  %v4877_v40 = vld [vmem:[#allocation7] ss:$0 sm:$0xff]  ;;  %v4878_v42 = vld [vmem:[#allocation7 + $0x1] ss:$0 sm:$0xff]  ;;  %v4851_v47 = vld [vmem:[%s6525_s2 + $0x30] sm:$0xff]  ;;  %s5736_s21 = smov 104  }
  0x3a   :  { %5447 = vmatprep.subr.bf16.mxu0 %v5446_v17  ;;  %v4852_v48 = vld [vmem:[%s6525_s2 + $0x38] sm:$0xff]  ;;  %v4853_v52 = vld [vmem:[%s6525_s2 + $0x40] sm:$0xff]  ;;  %v4854_v53 = vld [vmem:[%s6525_s2 + $0x48] sm:$0xff] }
  0x3b   :  { %5449 = vmatpush3.bf16.msra.mxu0 %v5446_v17  ;;  %v5458_v51 = vpack.c.bf16 %v4852_v48, %v4851_v47  ;;  %v5462_v54 = vpack.c.bf16 %v4854_v53, %v4853_v52  ;;  %v4855_v55 = vld [vmem:[%s6525_s2 + $0x50] sm:$0xff]  ;;  %v4856_v56 = vld [vmem:[%s6525_s2 + $0x58] sm:$0xff]  ;;  %v4879_v59 = vld [vmem:[#allocation7 + $0x6] ss:$0 sm:$0xff] }
  0x3c   :  { %172 = vadd.xlane.f32.xlu0 %v171_v3  ;;  %5451 = vmatprep.subr.bf16.mxu0 %v5450_v19  ;;  %v5466_v57 = vpack.c.bf16 %v4856_v56, %v4855_v55  ;;  %v4882_v2 = vld [vmem:[#allocation7 + $0x7] ss:$0 sm:$0xff] }
  0x3f   :  { %5453 = vmatpush3.bf16.msra.mxu0 %v5450_v19 }
  0x40   :  { %5455 = vmatprep.subr.bf16.mxu0 %v5454_v22 }
  0xc5   :  { %v170_v4 = vpop.xlane.xlu0 %169 }
  0xc6   :  { %v175_v5 = vmul.f32 0.03125, %v170_v4 }
  0xc8   :  { %v177_v6 = vsub.f32 %v5830_v0, %v175_v5 }
  0xc9   :  { %v173_v7 = vpop.xlane.xlu0 %172 }
  0xca   :  { %v176_v8 = vmul.f32 0.03125, %v173_v7  ;;  %v179_v9 = vmul.f32 %v177_v6, %v177_v6  ;;  %v4885_v7 = vld [vmem:[#allocation7 + $0x8] ss:$0 sm:$0xff] }
  0xcc   :  { %v178_v10 = vsub.f32 %v5832_v1, %v176_v8  ;;  %v181_v11 = vsel %vm167_vm0, %v179_v9, 0.0 }
  0xcd   :  { %182 = vadd.xlane.f32.xlu1 %v181_v11 }
  0xce   :  { %v180_v12 = vmul.f32 %v178_v10, %v178_v10 }
  0xd0   :  { %v184_v13 = vsel %vm167_vm0, %v180_v12, 0.0 }
  0xd1   :  { %185 = vadd.xlane.f32.xlu1 %v184_v13 }
 0x15a   :  { %v183_v23 = vpop.xlane.xlu1 %182 }
 0x15b   :  { %v187_v24 = vmul.f32 0.032258064, %v183_v23 }
 0x15d   :  { %5545 = vrsqrt.f32 %v187_v24  ;;  %vm191_vm1 = vcmp.eq.f32.partialorder %v187_v24, inf  ;;  %v194_v29 = vand.u32 2147483648, %v187_v24  ;;  %vm193_vm2 = vcmp.eq.f32.partialorder %v187_v24, 0.0 }
 0x15e   :  { %v186_v25 = vpop.xlane.xlu1 %185 }
 0x15f   :  { %v188_v26 = vmul.f32 0.032258064, %v186_v25 }
 0x161   :  { %5547 = vrsqrt.f32 %v188_v26  ;;  %vm198_vm3 = vcmp.eq.f32.partialorder %v188_v26, inf  ;;  %v201_v35 = vand.u32 2147483648, %v188_v26  ;;  %vm200_vm4 = vcmp.eq.f32.partialorder %v188_v26, 0.0 }
 0x167   :  { %v5546_v27 = vpop.eup %5545 }
 0x168   :  { %v190_v28 = vmul.f32 %v5546_v27, %v187_v24 }
 0x16a   :  { %v192_v30 = vsel %vm191_vm1, %v187_v24, %v190_v28 }
 0x16b   :  { %v5548_v31 = vpop.eup %5547  ;;  %v195_v32 = vsel %vm193_vm2, %v194_v29, %v192_v30 }
 0x16c   :  { %v197_v33 = vmul.f32 %v5548_v31, %v188_v26  ;;  %v203_v34 = vadd.f32 1e-06, %v195_v32 }
 0x16e   :  { %v199_v36 = vsel %vm198_vm3, %v188_v26, %v197_v33  ;;  %5549 = vrcp.f32 %v203_v34 }
 0x16f   :  { %v202_v37 = vsel %vm200_vm4, %v201_v35, %v199_v36  ;;  %v5937_v36 = vld [vmem:[%s6525_s2 + $0x68] sm:$0xff] }
 0x170   :  { %v204_v38 = vadd.f32 1e-06, %v202_v37 }
 0x172   :  { %5551 = vrcp.f32 %v204_v38 }
 0x178   :  { %v5550_v39 = vpop.eup %5549 }
 0x179   :  { %v207_v41 = vmul.f32 %v5550_v39, %v177_v6 }
 0x17b   :  { %v213_v43 = vmul.f32 %v4877_v40, %v207_v41 }
 0x17c   :  { %v5552_v44 = vpop.eup %5551 }
 0x17d   :  { %v208_v45 = vmul.f32 %v5552_v44, %v178_v10  ;;  %v219_v46 = vadd.f32 %v4878_v42, %v213_v43 }
 0x17f   :  { %v214_v49 = vmul.f32 %v4877_v40, %v208_v45  ;;  %5148 = vmatprep.mubr.msk.f32.mxu0 %vm167_vm0, %v219_v46  ;;  %v5944_v40 = vld [vmem:[%s6525_s2 + $0x60] sm:$0xff] }
 0x181   :  { %v220_v50 = vadd.f32 %v4878_v42, %v214_v49 }
 0x183   :  { %5149 = vmatmul.mubr.msk.f32.vlgmr.msra.gmra.mrb[0].mxu0 %vm167_vm0, %v220_v50 }
 0x184   :  { %5457 = vmatpush3.bf16.msra.mxu0 %v5454_v22  ;;  %5159 = vmatprep.mubr.msk.f32.mxu0 %vm167_vm0, %v219_v46 }
 0x185   :  { %5459 = vmatprep.subr.bf16.mxu0 %v5458_v51 }
 0x188   :  { %5461 = vmatpush3.bf16.msra.mxu0 %v5458_v51 }
 0x189   :  { %5463 = vmatprep.subr.bf16.mxu0 %v5462_v54 }
 0x18b   :  { %5160 = vmatmul.mubr.msk.f32.vlgmr.msra.gmra.mrb[2].mxu0 %vm167_vm0, %v220_v50 }
 0x18c   :  { %5465 = vmatpush3.bf16.msra.mxu0 %v5462_v54  ;;  %5170 = vmatprep.mubr.msk.f32.mxu0 %vm167_vm0, %v219_v46 }
 0x18d   :  { %5467 = vmatprep.subr.bf16.mxu0 %v5466_v57 }
 0x190   :  { %5469 = vmatpush3.bf16.msra.mxu0 %v5466_v57 }
 0x191   :  { %5173 = vmatprep.subr.mxu0 %v5732_v58 }
 0x193   :  { %5171 = vmatmul.mubr.msk.f32.vlgmr.msra.gmra.mrb[4].mxu0 %vm167_vm0, %v220_v50 }
 0x194   :  { %5175 = vmatprep.mubr.msk.f32.mxu0 %vm5733_vm5, %v5732_v58 }
 0x256   :  { %v5150_v60 = vpop.f32.mrb[0].mxu0 }
 0x257   :  { %v5890_v61 = vadd.f32 %v5150_v60, %v4879_v59  ;;  %v297_v62 = vpop.f32.mrb[1].mxu0 }
 0x258   :  { %v5892_v63 = vadd.f32 %v4879_v59, %v297_v62 }
 0x25a   :  { %626 = vrot.lane.b32.xlu1 %v5892_v63, %s5734_s3 }
 0x25e   :  { %v5161_v3 = vpop.f32.mrb[2].mxu0 }
 0x25f   :  { %v5896_v4 = vadd.f32 %v5161_v3, %v4882_v2  ;;  %v376_v5 = vpop.f32.mrb[3].mxu0 }
 0x260   :  { %v5898_v6 = vadd.f32 %v4882_v2, %v376_v5 }
 0x262   :  { %628 = vrot.lane.b32.xlu0 %v5898_v6, %s5734_s3  ;;  %5174 = vmatpush3.xpose.msk.msra.mxu0 %vm464_vm6, %v5898_v6 }
 0x263   :  { %5183 = vmatprep.subr.mxu0 %v5732_v58 }
 0x265   :  { %5176 = vmatmul.mubr.msk.f32.vlgmr.msra.gmra.mrb[6].mxu0 %vm464_vm6, %v5892_v63 }
 0x266   :  { %v5172_v8 = vpop.f32.mrb[4].mxu0  ;;  %5185 = vmatprep.mubr.msk.f32.mxu0 %vm5733_vm5, %v5732_v58 }
 0x267   :  { %v5909_v9 = vadd.f32 %v5172_v8, %v4885_v7  ;;  %v455_v10 = vpop.f32.mrb[5].mxu0  ;;  %v5982_v8 = vld [vmem:[%s6525_s2 + $0x70] sm:$0xff] }
 0x268   :  { %v5911_v11 = vadd.f32 %v4885_v7, %v455_v10 }
 0x26a   :  { %5179 = vmatpush3.msra.mxu1 %v5911_v11 }
 0x26b   :  { %5188 = vmatprep.subr.mxu1 %v5732_v58 }
 0x2cc   :  { %v627_v13 = vpop.permute.xlu1 %626 }
 0x2d4   :  { %v629_v12 = vpop.permute.xlu0 %628 }
 0x2d5   :  { %5184 = vmatpush3.xpose.msk.msra.mxu0 %vm464_vm6, %v629_v12 }
 0x2d6   :  { %5193 = vmatprep.subr.mxu0 %v5732_v58 }
 0x2d8   :  { %5186 = vmatmul.mubr.msk.f32.vlgmr.msra.gmra.mrb[8].mxu0 %vm464_vm6, %v627_v13 }
 0x2d9   :  { %5195 = vmatprep.mubr.msk.f32.mxu0 %vm5733_vm5, %v5732_v58  ;;  %5194 = vmatpush3.msra.mxu0 %v5937_v36 }
 0x2da   :  { %5203 = vmatprep.subr.mxu0 %v5732_v58 }
 0x338   :  { %v537_v14 = vpop.f32.mrb[6].mxu0 }
 0x339   :  { %v541_v15 = vmul.f32 0.35355338, %v537_v14  ;;  %v5177_v16 = vpop.f32.mrb[7].mxu0 }
 0x33b   :  { %v542_v17 = vsel %vm464_vm6, %v541_v15, -inf }
 0x33c   :  { %543 = vmax.xlane.f32.xlu1 %v542_v17 }
 0x3ab   :  { %v700_v18 = vpop.f32.mrb[8].mxu0 }
 0x3ac   :  { %v704_v19 = vmul.f32 0.35355338, %v700_v18  ;;  %v5187_v20 = vpop.f32.mrb[9].mxu0 }
 0x3ae   :  { %v705_v21 = vsel %vm464_vm6, %v704_v19, -inf }
 0x3af   :  { %706 = vmax.xlane.f32.xlu0 %v705_v21 }
 0x3c9   :  { %v544_v22 = vpop.xlane.xlu1 %543 }
 0x3ca   :  { %v545_v23 = vsub.f32 %v541_v15, %v544_v22 }
 0x3cc   :  { %v546_v24 = vmul.f32 1.442695, %v545_v23 }
 0x3ce   :  { %5553 = vpow2.f32 %v546_v24 }
 0x3d8   :  { %v5554_v25 = vpop.eup %5553 }
 0x3d9   :  { %v548_v26 = vsel %vm464_vm6, %v5554_v25, 0.0 }
 0x3da   :  { %549 = vadd.xlane.f32.xlu0 %v548_v26 }
 0x3f0   :  { %717 = vrot.lane.b32.xlu0 %v5911_v11, %s5734_s3 }
 0x43c   :  { %v707_v27 = vpop.xlane.xlu0 %706 }
 0x43d   :  { %v708_v28 = vsub.f32 %v704_v19, %v707_v27 }
 0x43f   :  { %v709_v29 = vmul.f32 1.442695, %v708_v28 }
 0x441   :  { %5555 = vpow2.f32 %v709_v29 }
 0x44b   :  { %v5556_v30 = vpop.eup %5555 }
 0x44c   :  { %v711_v31 = vsel %vm464_vm6, %v5556_v30, 0.0 }
 0x44d   :  { %712 = vadd.xlane.f32.xlu1 %v711_v31 }
 0x45e   :  { %941 = vrot.lane.b32.xlu1 %v5898_v6, %s5735_s16 }
 0x462   :  { %939 = vrot.lane.b32.xlu1 %v5892_v63, %s5735_s16 }
 0x467   :  { %v550_v32 = vpop.xlane.xlu0 %549 }
 0x468   :  { %5557 = vrcp.f32 %v550_v32 }
 0x46b   :  { %v718_v35 = vpop.permute.xlu0 %717 }
 0x472   :  { %v5558_v33 = vpop.eup %5557 }
 0x473   :  { %v552_v34 = vmul.f32 %v5558_v33, %v5554_v25 }
 0x475   :  { %5181 = vmatmul.mubr.msk.f32.vlgmr.msra.gmra.mrb[0].mxu1 %vm464_vm6, %v552_v34 }
 0x476   :  { %5189 = vmatpush3.msra.mxu1 %v718_v35  ;;  %5190 = vmatprep.mubr.msk.f32.mxu1 %vm5733_vm5, %v5732_v58 }
 0x477   :  { %5198 = vmatprep.subr.mxu1 %v5732_v58 }
 0x4da   :  { %v713_v37 = vpop.xlane.xlu1 %712 }
 0x4db   :  { %5559 = vrcp.f32 %v713_v37 }
 0x4de   :  { %v942_v43 = vpop.permute.xlu1 %941 }
 0x4e2   :  { %v940_v46 = vpop.permute.xlu1 %939 }
 0x4e5   :  { %v5560_v38 = vpop.eup %5559 }
 0x4e6   :  { %v715_v39 = vmul.f32 %v5560_v38, %v5556_v30 }
 0x4e8   :  { %5191 = vmatmul.mubr.msk.f32.vlgmr.msra.gmra.mrb[2].mxu1 %vm464_vm6, %v715_v39 }
 0x4e9   :  { %5199 = vmatpush3.msra.mxu1 %v5944_v40  ;;  %5200 = vmatprep.mubr.msk.f32.mxu1 %vm5733_vm5, %v5732_v58 }
 0x4ea   :  { %5208 = vmatprep.subr.mxu1 %v5732_v58 }
 0x548   :  { %v622_v41 = vpop.f32.mrb[0].mxu1 }
 0x549   :  { %v5182_v42 = vpop.f32.mrb[1].mxu1  ;;  %5201 = vmatmul.mubr.msk.f32.vlgmr.msra.gmra.mrb[4].mxu1 %vm464_vm6, %v622_v41 }
 0x54a   :  { %5210 = vmatprep.mubr.msk.f32.mxu1 %vm5733_vm5, %v5732_v58 }
 0x5bb   :  { %v789_v44 = vpop.f32.mrb[2].mxu1 }
 0x5bc   :  { %v5192_v45 = vpop.f32.mrb[3].mxu1  ;;  %5196 = vmatmul.mubr.msk.f32.vlgmr.msra.gmra.mrb[10].mxu0 %vm464_vm6, %v789_v44 }
 0x5bd   :  { %5204 = vmatpush3.xpose.msk.msra.mxu0 %vm464_vm6, %v942_v43  ;;  %5205 = vmatprep.mubr.msk.f32.mxu0 %vm5733_vm5, %v5732_v58 }
 0x5be   :  { %5213 = vmatprep.subr.mxu0 %v5732_v58 }
 0x5c0   :  { %5206 = vmatmul.mubr.msk.f32.vlgmr.msra.gmra.mrb[12].mxu0 %vm464_vm6, %v940_v46 }
 0x5c1   :  { %5215 = vmatprep.mubr.msk.f32.mxu0 %vm5733_vm5, %v5732_v58  ;;  %5214 = vmatpush3.msra.mxu0 %v5982_v8 }
 0x5c2   :  { %5223 = vmatprep.subr.mxu0 %v5732_v58 }
 0x61c   :  { %v935_v47 = vpop.f32.mrb[4].mxu1 }
 0x61d   :  { %v5202_v48 = vpop.f32.mrb[5].mxu1 }
 0x68f   :  { %v862_v49 = vpop.f32.mrb[10].mxu0 }
 0x690   :  { %v936_v50 = vadd.f32 %v935_v47, %v862_v49  ;;  %v5197_v51 = vpop.f32.mrb[11].mxu0 }
 0x693   :  { %v1013_v52 = vpop.f32.mrb[12].mxu0 }
 0x694   :  { %v1017_v53 = vmul.f32 0.35355338, %v1013_v52  ;;  %v5207_v54 = vpop.f32.mrb[13].mxu0 }
 0x696   :  { %v1018_v55 = vsel %vm464_vm6, %v1017_v53, -inf }
 0x697   :  { %1019 = vmax.xlane.f32.xlu1 %v1018_v55 }
 0x6a8   :  { %1181 = vrot.lane.b32.xlu1 %v5898_v6, %s5736_s21 }
 0x6ac   :  { %1179 = vrot.lane.b32.xlu1 %v5892_v63, %s5736_s21 }
 0x724   :  { %v1020_v56 = vpop.xlane.xlu1 %1019 }
 0x725   :  { %v1021_v57 = vsub.f32 %v1017_v53, %v1020_v56 }
 0x727   :  { %v1022_v59 = vmul.f32 1.442695, %v1021_v57 }
 0x728   :  { %v1182_v6 = vpop.permute.xlu1 %1181 }
 0x729   :  { %5561 = vpow2.f32 %v1022_v59 }
 0x72c   :  { %v1180_v7 = vpop.permute.xlu1 %1179 }
 0x733   :  { %v5562_v60 = vpop.eup %5561 }
 0x734   :  { %v1024_v62 = vsel %vm464_vm6, %v5562_v60, 0.0 }
 0x735   :  { %1025 = vadd.xlane.f32.xlu0 %v1024_v62 }
 0x74b   :  { %1029 = vrot.lane.b32.xlu0 %v5911_v11, %s5735_s16 }
 0x7c2   :  { %v1026_v2 = vpop.xlane.xlu0 %1025 }
 0x7c3   :  { %5563 = vrcp.f32 %v1026_v2 }
 0x7c6   :  { %v1030_v3 = vpop.permute.xlu0 %1029 }
 0x7c7   :  { %5209 = vmatpush3.msra.mxu1 %v1030_v3 }
 0x7c8   :  { %5218 = vmatprep.subr.mxu1 %v5732_v58 }
 0x7cd   :  { %v5564_v5 = vpop.eup %5563 }
 0x7ce   :  { %v1028_v63 = vmul.f32 %v5564_v5, %v5562_v60 }
 0x7d0   :  { %5211 = vmatmul.mubr.msk.f32.vlgmr.msra.gmra.mrb[6].mxu1 %vm464_vm6, %v1028_v63 }
 0x7d1   :  { %5219 = vmatpush3.xpose.msk.msra.mxu1 %vm464_vm6, %v1182_v6  ;;  %5220 = vmatprep.mubr.msk.f32.mxu1 %vm5733_vm5, %v5732_v58 }
 0x7d2   :  { %5228 = vmatprep.subr.mxu1 %v5732_v58 }
 0x7d4   :  { %5221 = vmatmul.mubr.msk.f32.vlgmr.msra.gmra.mrb[8].mxu1 %vm464_vm6, %v1180_v7 }
 0x7d5   :  { %5230 = vmatprep.mubr.msk.f32.mxu1 %vm5733_vm5, %v5732_v58 }
 0x8a3   :  { %v1101_v10 = vpop.f32.mrb[6].mxu1 }
 0x8a4   :  { %v5212_v12 = vpop.f32.mrb[7].mxu1  ;;  %5216 = vmatmul.mubr.msk.f32.vlgmr.msra.gmra.mrb[14].mxu0 %vm464_vm6, %v1101_v10 }
 0x8a5   :  { %5225 = vmatprep.mubr.msk.f32.mxu0 %vm5733_vm5, %v5732_v58 }
 0x8a7   :  { %v1253_v13 = vpop.f32.mrb[8].mxu1 }
 0x8a8   :  { %v1257_v14 = vmul.f32 0.35355338, %v1253_v13  ;;  %v5222_v15 = vpop.f32.mrb[9].mxu1 }
 0x8aa   :  { %v1258_v16 = vsel %vm464_vm6, %v1257_v14, -inf }
 0x8ab   :  { %1259 = vmax.xlane.f32.xlu0 %v1258_v16 }
 0x8c1   :  { %1269 = vrot.lane.b32.xlu0 %v5911_v11, %s5736_s21  ;;  %v6001_v11 = vld [vmem:[%s6525_s2 + $0x78] sm:$0xff] }
 0x8c2   :  { %5229 = vmatpush3.msra.mxu1 %v6001_v11 }
 0x8c3   :  { %5238 = vmatprep.subr.mxu1 %v5732_v58 }
 0x8c5   :  { %1580 = vrot.lane.b32.xlu0 %v5890_v61, %s5734_s3 }
 0x938   :  { %v1260_v17 = vpop.xlane.xlu0 %1259 }
 0x939   :  { %v1261_v18 = vsub.f32 %v1257_v14, %v1260_v17 }
 0x93b   :  { %v1262_v19 = vmul.f32 1.442695, %v1261_v18 }
 0x93c   :  { %v1270_v20 = vpop.permute.xlu0 %1269 }
 0x93d   :  { %5565 = vpow2.f32 %v1262_v19  ;;  %5224 = vmatpush3.msra.mxu0 %v1270_v20 }
 0x93e   :  { %5233 = vmatprep.subr.mxu0 %v5732_v58 }
 0x940   :  { %v1581_v30 = vpop.permute.xlu0 %1580 }
 0x947   :  { %v5566_v21 = vpop.eup %5565 }
 0x948   :  { %v1264_v22 = vsel %vm464_vm6, %v5566_v21, 0.0 }
 0x949   :  { %1265 = vadd.xlane.f32.xlu1 %v1264_v22 }
 0x95a   :  { %1582 = vrot.lane.b32.xlu1 %v5896_v4, %s5734_s3 }
 0x977   :  { %v1174_v23 = vpop.f32.mrb[14].mxu0 }
 0x978   :  { %v1178_v24 = vadd.f32 %v1174_v23, %v936_v50  ;;  %v5217_v25 = vpop.f32.mrb[15].mxu0 }
 0x9d6   :  { %v1266_v26 = vpop.xlane.xlu1 %1265 }
 0x9d7   :  { %5567 = vrcp.f32 %v1266_v26 }
 0x9da   :  { %v1583_v29 = vpop.permute.xlu1 %1582 }
 0x9e1   :  { %v5568_v27 = vpop.eup %5567 }
 0x9e2   :  { %v1268_v28 = vmul.f32 %v5568_v27, %v5566_v21 }
 0x9e4   :  { %5226 = vmatmul.mubr.msk.f32.vlgmr.msra.gmra.mrb[16].mxu0 %vm464_vm6, %v1268_v28  ;;  %v4920_v28 = vld [vmem:[#allocation7 + $0x9] ss:$0 sm:$0xff] }
 0x9e5   :  { %5234 = vmatpush3.xpose.msk.msra.mxu0 %vm464_vm6, %v5896_v4  ;;  %5235 = vmatprep.mubr.msk.f32.mxu0 %vm5733_vm5, %v5732_v58 }
 0x9e6   :  { %5243 = vmatprep.subr.mxu0 %v5732_v58 }
 0x9e8   :  { %5236 = vmatmul.mubr.msk.f32.vlgmr.msra.gmra.mrb[18].mxu0 %vm464_vm6, %v5890_v61 }
 0x9e9   :  { %5244 = vmatpush3.xpose.msk.msra.mxu0 %vm464_vm6, %v1583_v29  ;;  %5245 = vmatprep.mubr.msk.f32.mxu0 %vm5733_vm5, %v5732_v58 }
 0x9ea   :  { %5253 = vmatprep.subr.mxu0 %v5732_v58 }
 0x9ec   :  { %5246 = vmatmul.mubr.msk.f32.vlgmr.msra.gmra.mrb[20].mxu0 %vm464_vm6, %v1581_v30 }
 0x9ed   :  { %5254 = vmatpush3.msra.mxu0 %v5937_v36  ;;  %5255 = vmatprep.mubr.msk.f32.mxu0 %vm5733_vm5, %v5732_v58 }
 0x9ee   :  { %5263 = vmatprep.subr.mxu0 %v5732_v58 }
 0xab7   :  { %v1341_v31 = vpop.f32.mrb[16].mxu0 }
 0xab8   :  { %v5227_v32 = vpop.f32.mrb[17].mxu0  ;;  %5231 = vmatmul.mubr.msk.f32.vlgmr.msra.gmra.mrb[10].mxu1 %vm464_vm6, %v1341_v31 }
 0xab9   :  { %5239 = vmatpush3.msra.mxu1 %v5909_v9  ;;  %5240 = vmatprep.mubr.msk.f32.mxu1 %vm5733_vm5, %v5732_v58 }
 0xaba   :  { %5248 = vmatprep.subr.mxu1 %v5732_v58 }
 0xabb   :  { %v1491_v33 = vpop.f32.mrb[18].mxu0 }
 0xabc   :  { %v1495_v34 = vmul.f32 0.35355338, %v1491_v33  ;;  %v5237_v35 = vpop.f32.mrb[19].mxu0 }
 0xabe   :  { %v1496_v36 = vsel %vm464_vm6, %v1495_v34, -inf }
 0xabf   :  { %1497 = vmax.xlane.f32.xlu1 %v1496_v36  ;;  %v1654_v37 = vpop.f32.mrb[20].mxu0 }
 0xac0   :  { %v1658_v38 = vmul.f32 0.35355338, %v1654_v37  ;;  %v5247_v39 = vpop.f32.mrb[21].mxu0 }
 0xac2   :  { %v1659_v41 = vsel %vm464_vm6, %v1658_v38, -inf }
 0xac3   :  { %1660 = vmax.xlane.f32.xlu0 %v1659_v41 }
 0xad0   :  { %1671 = vrot.lane.b32.xlu1 %v5909_v9, %s5734_s3 }
 0xad4   :  { %1893 = vrot.lane.b32.xlu1 %v5890_v61, %s5735_s16 }
 0xb4c   :  { %v1498_v42 = vpop.xlane.xlu1 %1497 }
 0xb4d   :  { %v1499_v43 = vsub.f32 %v1495_v34, %v1498_v42 }
 0xb4f   :  { %v1500_v44 = vmul.f32 1.442695, %v1499_v43 }
 0xb50   :  { %v1661_v45 = vpop.xlane.xlu0 %1660  ;;  %v1672_v60 = vpop.permute.xlu1 %1671 }
 0xb51   :  { %5569 = vpow2.f32 %v1500_v44  ;;  %v1662_v46 = vsub.f32 %v1658_v38, %v1661_v45 }
 0xb53   :  { %v1663_v47 = vmul.f32 1.442695, %v1662_v46 }
 0xb55   :  { %5571 = vpow2.f32 %v1663_v47 }
 0xb5b   :  { %v5570_v48 = vpop.eup %5569 }
 0xb5c   :  { %v1502_v49 = vsel %vm464_vm6, %v5570_v48, 0.0 }
 0xb5d   :  { %1503 = vadd.xlane.f32.xlu0 %v1502_v49 }
 0xb5f   :  { %v5572_v50 = vpop.eup %5571 }
 0xb60   :  { %v1665_v51 = vsel %vm464_vm6, %v5572_v50, 0.0 }
 0xb61   :  { %1666 = vadd.xlane.f32.xlu0 %v1665_v51 }
 0xb77   :  { %1895 = vrot.lane.b32.xlu0 %v5896_v4, %s5735_s16 }
 0xb8b   :  { %v1414_v52 = vpop.f32.mrb[10].mxu1 }
 0xb8c   :  { %v6037_v53 = vadd.f32 %v1414_v52, %v1178_v24  ;;  %v5232_v54 = vpop.f32.mrb[11].mxu1 }
 0xb8e   :  { %v2377_v31 = vadd.f32 %v4920_v28, %v6037_v53 }
 0xb90   :  { %v6084_v35 = vadd.f32 %v2377_v31, %v5830_v0 }
 0xb92   :  { %v2381_v36 = vsel %vm167_vm0, %v6084_v35, 0.0 }
 0xbea   :  { %v1504_v55 = vpop.xlane.xlu0 %1503 }
 0xbeb   :  { %5573 = vrcp.f32 %v1504_v55 }
 0xbee   :  { %v1667_v56 = vpop.xlane.xlu0 %1666 }
 0xbef   :  { %5575 = vrcp.f32 %v1667_v56 }
 0xbf2   :  { %v1896_v63 = vpop.permute.xlu0 %1895 }
 0xbf5   :  { %v5574_v57 = vpop.eup %5573 }
 0xbf6   :  { %v1506_v59 = vmul.f32 %v5574_v57, %v5570_v48 }
 0xbf8   :  { %5241 = vmatmul.mubr.msk.f32.vlgmr.msra.gmra.mrb[12].mxu1 %vm464_vm6, %v1506_v59 }
 0xbf9   :  { %v5576_v62 = vpop.eup %5575  ;;  %5249 = vmatpush3.msra.mxu1 %v1672_v60  ;;  %5250 = vmatprep.mubr.msk.f32.mxu1 %vm5733_vm5, %v5732_v58 }
 0xbfa   :  { %v1669_v2 = vmul.f32 %v5576_v62, %v5572_v50  ;;  %5258 = vmatprep.subr.mxu1 %v5732_v58 }
 0xbfc   :  { %5251 = vmatmul.mubr.msk.f32.vlgmr.msra.gmra.mrb[14].mxu1 %vm464_vm6, %v1669_v2 }
 0xbfd   :  { %5259 = vmatpush3.msra.mxu1 %v5944_v40  ;;  %5260 = vmatprep.mubr.msk.f32.mxu1 %vm5733_vm5, %v5732_v58  ;;  %v1894_v40 = vpop.permute.xlu1 %1893 }
 0xbfe   :  { %5268 = vmatprep.subr.mxu1 %v5732_v58 }
 0xccb   :  { %v1576_v3 = vpop.f32.mrb[12].mxu1 }
 0xccc   :  { %v5242_v5 = vpop.f32.mrb[13].mxu1  ;;  %5261 = vmatmul.mubr.msk.f32.vlgmr.msra.gmra.mrb[16].mxu1 %vm464_vm6, %v1576_v3 }
 0xccd   :  { %5270 = vmatprep.mubr.msk.f32.mxu1 %vm5733_vm5, %v5732_v58 }
 0xccf   :  { %v1743_v6 = vpop.f32.mrb[14].mxu1 }
 0xcd0   :  { %v5252_v7 = vpop.f32.mrb[15].mxu1  ;;  %5256 = vmatmul.mubr.msk.f32.vlgmr.msra.gmra.mrb[22].mxu0 %vm464_vm6, %v1743_v6 }
 0xcd1   :  { %5264 = vmatpush3.xpose.msk.msra.mxu0 %vm464_vm6, %v1896_v63  ;;  %5265 = vmatprep.mubr.msk.f32.mxu0 %vm5733_vm5, %v5732_v58 }
 0xcd2   :  { %5273 = vmatprep.subr.mxu0 %v5732_v58 }
 0xcd4   :  { %5266 = vmatmul.mubr.msk.f32.vlgmr.msra.gmra.mrb[24].mxu0 %vm464_vm6, %v1894_v40 }
 0xcd5   :  { %5274 = vmatpush3.msra.mxu0 %v5982_v8  ;;  %5275 = vmatprep.mubr.msk.f32.mxu0 %vm5733_vm5, %v5732_v58 }
 0xcd6   :  { %5283 = vmatprep.subr.mxu0 %v5732_v58 }
 0xd9f   :  { %v1889_v10 = vpop.f32.mrb[16].mxu1 }
 0xda0   :  { %v5262_v12 = vpop.f32.mrb[17].mxu1 }
 0xda3   :  { %v1816_v13 = vpop.f32.mrb[22].mxu0 }
 0xda4   :  { %v1890_v14 = vadd.f32 %v1889_v10, %v1816_v13  ;;  %v5257_v15 = vpop.f32.mrb[23].mxu0 }
 0xda7   :  { %v1967_v16 = vpop.f32.mrb[24].mxu0 }
 0xda8   :  { %v1971_v17 = vmul.f32 0.35355338, %v1967_v16  ;;  %v5267_v18 = vpop.f32.mrb[25].mxu0 }
 0xdaa   :  { %v1972_v19 = vsel %vm464_vm6, %v1971_v17, -inf }
 0xdab   :  { %1973 = vmax.xlane.f32.xlu1 %v1972_v19  ;;  %v4922_v19 = vld [vmem:[#allocation7 + $0x3] ss:$0 sm:$0xff] }
 0xdbc   :  { %2135 = vrot.lane.b32.xlu1 %v5896_v4, %s5736_s21 }
 0xdc0   :  { %2133 = vrot.lane.b32.xlu1 %v5890_v61, %s5736_s21 }
 0xe38   :  { %v1974_v8 = vpop.xlane.xlu1 %1973 }
 0xe39   :  { %v1975_v20 = vsub.f32 %v1971_v17, %v1974_v8  ;;  %v4921_v17 = vld [vmem:[#allocation7 + $0x2] ss:$0 sm:$0xff] }
 0xe3b   :  { %v1976_v21 = vmul.f32 1.442695, %v1975_v20 }
 0xe3c   :  { %v2136_v26 = vpop.permute.xlu1 %2135 }
 0xe3d   :  { %5577 = vpow2.f32 %v1976_v21  ;;  %v4865_v21 = vld [vmem:[%s6525_s2 + $0xa0] sm:$0xff] }
 0xe40   :  { %v2134_v27 = vpop.permute.xlu1 %2133 }
 0xe47   :  { %v5578_v22 = vpop.eup %5577 }
 0xe48   :  { %v1978_v23 = vsel %vm464_vm6, %v5578_v22, 0.0 }
 0xe49   :  { %1979 = vadd.xlane.f32.xlu0 %v1978_v23  ;;  %v4861_v23 = vld [vmem:[%s6525_s2 + $0x80] sm:$0xff] }
 0xe5f   :  { %1983 = vrot.lane.b32.xlu0 %v5909_v9, %s5735_s16 }
 0xed6   :  { %v1980_v24 = vpop.xlane.xlu0 %1979 }
 0xed7   :  { %5579 = vrcp.f32 %v1980_v24 }
 0xeda   :  { %v1984_v25 = vpop.permute.xlu0 %1983 }
 0xedb   :  { %5269 = vmatpush3.msra.mxu1 %v1984_v25  ;;  %v4862_v25 = vld [vmem:[%s6525_s2 + $0x88] sm:$0xff] }
 0xedc   :  { %5278 = vmatprep.subr.mxu1 %v5732_v58 }
 0xee1   :  { %v5580_v4 = vpop.eup %5579 }
 0xee2   :  { %v1982_v61 = vmul.f32 %v5580_v4, %v5578_v22  ;;  %v4866_v22 = vld [vmem:[%s6525_s2 + $0xa8] sm:$0xff]  ;;  %v4867_v4 = vld [vmem:[%s6525_s2 + $0xb0] sm:$0xff] }
 0xee3   :  { %v5478_v24 = vpack.c.bf16 %v4866_v22, %v4865_v21 }
 0xee4   :  { %5271 = vmatmul.mubr.msk.f32.vlgmr.msra.gmra.mrb[18].mxu1 %vm464_vm6, %v1982_v61  ;;  %v5470_v61 = vpack.c.bf16 %v4862_v25, %v4861_v23 }
 0xee5   :  { %5279 = vmatpush3.xpose.msk.msra.mxu1 %vm464_vm6, %v2136_v26  ;;  %5280 = vmatprep.mubr.msk.f32.mxu1 %vm5733_vm5, %v5732_v58  ;;  %v4868_v26 = vld [vmem:[%s6525_s2 + $0xb8] sm:$0xff] }
 0xee6   :  { %5288 = vmatprep.subr.mxu1 %v5732_v58 }
 0xee8   :  { %5281 = vmatmul.mubr.msk.f32.vlgmr.msra.gmra.mrb[20].mxu1 %vm464_vm6, %v2134_v27  ;;  %v5482_v27 = vpack.c.bf16 %v4868_v26, %v4867_v4 }
 0xee9   :  { %5289 = vmatpush3.msra.mxu1 %v6001_v11  ;;  %5290 = vmatprep.mubr.msk.f32.mxu1 %vm5733_vm5, %v5732_v58 }
 0xeea   :  { %5479 = vmatprep.subr.bf16.mxu1 %v5478_v24 }
 0xfb7   :  { %v2055_v29 = vpop.f32.mrb[18].mxu1 }
 0xfb8   :  { %v5272_v30 = vpop.f32.mrb[19].mxu1  ;;  %5276 = vmatmul.mubr.msk.f32.vlgmr.msra.gmra.mrb[26].mxu0 %vm464_vm6, %v2055_v29  ;;  %v4863_v29 = vld [vmem:[%s6525_s2 + $0x90] sm:$0xff] }
 0xfb9   :  { %5285 = vmatprep.mubr.msk.f32.mxu0 %vm5733_vm5, %v5732_v58  ;;  %v4864_v30 = vld [vmem:[%s6525_s2 + $0x98] sm:$0xff] }
 0xfba   :  { %v5474_v31 = vpack.c.bf16 %v4864_v30, %v4863_v29 }
 0xfbb   :  { %v2207_v32 = vpop.f32.mrb[20].mxu1 }
 0xfbc   :  { %v2211_v33 = vmul.f32 0.35355338, %v2207_v32  ;;  %v5282_v34 = vpop.f32.mrb[21].mxu1  ;;  %v71_v32 = vld [vmem:[#allocation5 + $0x8] sm:$0xff] }
 0xfbe   :  { %v2212_v11 = vsel %vm464_vm6, %v2211_v33, -inf }
 0xfbf   :  { %2213 = vmax.xlane.f32.xlu1 %v2212_v11 }
 0xfc3   :  { %2382 = vadd.xlane.f32.xlu1 %v2381_v36 }
0x104c   :  { %v2214_v37 = vpop.xlane.xlu1 %2213 }
0x104d   :  { %v2215_v38 = vsub.f32 %v2211_v33, %v2214_v37 }
0x104f   :  { %v2216_v39 = vmul.f32 1.442695, %v2215_v38 }
0x1050   :  { %v2383_v51 = vpop.xlane.xlu1 %2382 }
0x1051   :  { %5581 = vpow2.f32 %v2216_v39  ;;  %v2387_v52 = vmul.f32 0.03125, %v2383_v51  ;;  %v4870_v51 = vld [vmem:[%s6525_s2 + $0xc8] sm:$0xff] }
0x1053   :  { %v2389_v55 = vsub.f32 %v6084_v35, %v2387_v52  ;;  %v4871_v52 = vld [vmem:[%s6525_s2 + $0xd0] sm:$0xff] }
0x1055   :  { %v2391_v60 = vmul.f32 %v2389_v55, %v2389_v55 }
0x1057   :  { %v2393_v62 = vsel %vm167_vm0, %v2391_v60, 0.0 }
0x105b   :  { %v5582_v41 = vpop.eup %5581 }
0x105c   :  { %v2218_v42 = vsel %vm464_vm6, %v5582_v41, 0.0 }
0x105d   :  { %2219 = vadd.xlane.f32.xlu0 %v2218_v42 }
0x1073   :  { %2223 = vrot.lane.b32.xlu0 %v5909_v9, %s5736_s21 }
0x108b   :  { %v2128_v0 = vpop.f32.mrb[26].mxu0 }
0x108c   :  { %v2132_v43 = vadd.f32 %v2128_v0, %v1890_v14  ;;  %v5277_v44 = vpop.f32.mrb[27].mxu0 }
0x10ea   :  { %v2220_v45 = vpop.xlane.xlu0 %2219 }
0x10eb   :  { %5583 = vrcp.f32 %v2220_v45  ;;  %v4926_v45 = vld [vmem:[#allocation7 + $0xb] ss:$0 sm:$0xff] }
0x10ee   :  { %v2224_v46 = vpop.permute.xlu0 %2223 }
0x10ef   :  { %5284 = vmatpush3.msra.mxu0 %v2224_v46 }
0x10f0   :  { %5471 = vmatprep.subr.bf16.mxu0 %v5470_v61 }
0x10f5   :  { %v5584_v47 = vpop.eup %5583 }
0x10f6   :  { %v2222_v48 = vmul.f32 %v5584_v47, %v5582_v41 }
0x10f8   :  { %5286 = vmatmul.mubr.msk.f32.vlgmr.msra.gmra.mrb[28].mxu0 %vm464_vm6, %v2222_v48 }
0x10f9   :  { %5473 = vmatpush3.bf16.msra.mxu0 %v5470_v61 }
0x10fa   :  { %5475 = vmatprep.subr.bf16.mxu0 %v5474_v31 }
0x10fd   :  { %5477 = vmatpush3.bf16.msra.mxu0 %v5474_v31 }
0x11cb   :  { %v2295_v49 = vpop.f32.mrb[28].mxu0 }
0x11cc   :  { %v5287_v50 = vpop.f32.mrb[29].mxu0  ;;  %5291 = vmatmul.mubr.msk.f32.vlgmr.msra.gmra.mrb[22].mxu1 %vm464_vm6, %v2295_v49 }
0x11cd   :  { %5481 = vmatpush3.bf16.msra.mxu1 %v5478_v24  ;;  %v4869_v50 = vld [vmem:[%s6525_s2 + $0xc0] sm:$0xff] }
0x11ce   :  { %5483 = vmatprep.subr.bf16.mxu1 %v5482_v27 }
0x11d1   :  { %5485 = vmatpush3.bf16.msra.mxu1 %v5482_v27 }
0x11d2   :  { %5326 = vmatprep.subr.mxu1 %v5732_v58 }
0x129f   :  { %v2368_v53 = vpop.f32.mrb[22].mxu1 }
0x12a0   :  { %v2372_v54 = vadd.f32 %v2368_v53, %v2132_v43  ;;  %v5292_v9 = vpop.f32.mrb[23].mxu1  ;;  %v5486_v53 = vpack.c.bf16 %v4870_v51, %v4869_v50 }
0x12a2   :  { %v2378_v56 = vadd.f32 %v4920_v28, %v2372_v54  ;;  %v70_v28 = vld [vmem:[#allocation5] sm:$0xff]  ;;  %v4872_v54 = vld [vmem:[%s6525_s2 + $0xd8] sm:$0xff]  ;;  %5487 = vmatprep.subr.bf16.mxu0 %v5486_v53 }
0x12a3   :  { %5312 = vmatprep.mubr.msk.f32.mxu1 %vm167_vm0, %v70_v28  ;;  %v5490_v9 = vpack.c.bf16 %v4872_v54, %v4871_v52 }
0x12a4   :  { %v6096_v57 = vadd.f32 %v2378_v56, %v5832_v1  ;;  %5313 = vmatmul.mubr.msk.f32.vlgmr.msra.gmra.mrb[24].mxu1 %vm167_vm0, %v71_v32  ;;  %v4923_v56 = vld [vmem:[#allocation7 + $0xa] ss:$0 sm:$0xff] }
0x12a5   :  { %5328 = vmatprep.mubr.msk.f32.mxu1 %vm5733_vm5, %v5732_v58 }
0x12a6   :  { %v2384_v59 = vsel %vm167_vm0, %v6096_v57, 0.0 }
0x12a7   :  { %2385 = vadd.xlane.f32.xlu1 %v2384_v59 }
0x12ab   :  { %2394 = vadd.xlane.f32.xlu1 %v2393_v62 }
0x1334   :  { %v2386_v2 = vpop.xlane.xlu1 %2385 }
0x1335   :  { %v2388_v3 = vmul.f32 0.03125, %v2386_v2 }
0x1337   :  { %v2390_v5 = vsub.f32 %v6096_v57, %v2388_v3  ;;  %v4929_v3 = vld [vmem:[#allocation7 + $0xc] ss:$0 sm:$0xff] }
0x1338   :  { %v2395_v6 = vpop.xlane.xlu1 %2394 }
0x1339   :  { %v2399_v63 = vmul.f32 0.032258064, %v2395_v6  ;;  %v2392_v7 = vmul.f32 %v2390_v5, %v2390_v5 }
0x133b   :  { %5585 = vrsqrt.f32 %v2399_v63  ;;  %v2396_v40 = vsel %vm167_vm0, %v2392_v7, 0.0  ;;  %vm2403_vm7 = vcmp.eq.f32.partialorder %v2399_v63, inf  ;;  %v2406_v12 = vand.u32 2147483648, %v2399_v63 }
0x133c   :  { %2397 = vadd.xlane.f32.xlu1 %v2396_v40  ;;  %vm2405_vm8 = vcmp.eq.f32.partialorder %v2399_v63, 0.0 }
0x1345   :  { %v5586_v1 = vpop.eup %5585 }
0x1346   :  { %v2402_v10 = vmul.f32 %v5586_v1, %v2399_v63 }
0x1348   :  { %v2404_v13 = vsel %vm2403_vm7, %v2399_v63, %v2402_v10 }
0x1349   :  { %v2407_v14 = vsel %vm2405_vm8, %v2406_v12, %v2404_v13 }
0x134a   :  { %v2415_v15 = vadd.f32 1e-06, %v2407_v14 }
0x134c   :  { %5587 = vrcp.f32 %v2415_v15 }
0x1356   :  { %v5588_v16 = vpop.eup %5587 }
0x1357   :  { %v2419_v18 = vmul.f32 %v5588_v16, %v2389_v55 }
0x1359   :  { %v2425_v8 = vmul.f32 %v4921_v17, %v2419_v18 }
0x135b   :  { %v2431_v20 = vadd.f32 %v4922_v19, %v2425_v8 }
0x135d   :  { %5301 = vmatprep.mubr.msk.f32.mxu0 %vm167_vm0, %v2431_v20 }
0x1377   :  { %v5314_v46 = vpop.f32.mrb[24].mxu1 }
0x1378   :  { %v6135_v47 = vadd.f32 %v5314_v46, %v4926_v45  ;;  %v2594_v48 = vpop.f32.mrb[25].mxu1 }
0x1379   :  { %v6137_v49 = vadd.f32 %v4926_v45, %v2594_v48 }
0x137b   :  { %2845 = vrot.lane.b32.xlu1 %v6137_v49, %s5734_s3  ;;  %5327 = vmatpush3.xpose.msk.msra.mxu1 %vm464_vm6, %v6137_v49 }
0x137c   :  { %5331 = vmatprep.subr.mxu1 %v5732_v58 }
0x13c9   :  { %v2398_v33 = vpop.xlane.xlu1 %2397 }
0x13ca   :  { %v2400_v34 = vmul.f32 0.032258064, %v2398_v33  ;;  %v6205_v33 = vld [vmem:[%s6525_s2 + $0xe0] sm:$0xff] }
0x13cc   :  { %5589 = vrsqrt.f32 %v2400_v34  ;;  %vm2410_vm9 = vcmp.eq.f32.partialorder %v2400_v34, inf  ;;  %v2413_v37 = vand.u32 2147483648, %v2400_v34  ;;  %vm2412_vm10 = vcmp.eq.f32.partialorder %v2400_v34, 0.0 }
0x13d6   :  { %v5590_v11 = vpop.eup %5589 }
0x13d7   :  { %v2409_v36 = vmul.f32 %v5590_v11, %v2400_v34 }
0x13d9   :  { %v2411_v38 = vsel %vm2410_vm9, %v2400_v34, %v2409_v36 }
0x13da   :  { %v2414_v39 = vsel %vm2412_vm10, %v2413_v37, %v2411_v38 }
0x13db   :  { %v2416_v41 = vadd.f32 1e-06, %v2414_v39 }
0x13dd   :  { %5591 = vrcp.f32 %v2416_v41 }
0x13e7   :  { %v5592_v42 = vpop.eup %5591 }
0x13e8   :  { %v2420_v0 = vmul.f32 %v5592_v42, %v2390_v5 }
0x13ea   :  { %v2426_v43 = vmul.f32 %v4921_v17, %v2420_v0 }
0x13ec   :  { %v2432_v44 = vadd.f32 %v4922_v19, %v2426_v43 }
0x13ed   :  { %v2846_v55 = vpop.permute.xlu1 %2845 }
0x13ee   :  { %5302 = vmatmul.mubr.msk.f32.vlgmr.msra.gmra.mrb[30].mxu0 %vm167_vm0, %v2432_v44 }
0x13ef   :  { %5323 = vmatprep.mubr.msk.f32.mxu0 %vm167_vm0, %v70_v28  ;;  %5489 = vmatpush3.bf16.msra.mxu0 %v5486_v53  ;;  %v6197_v28 = vld [vmem:[%s6525_s2 + $0xe8] sm:$0xff] }
0x13f0   :  { %5491 = vmatprep.subr.bf16.mxu0 %v5490_v9 }
0x13f3   :  { %5493 = vmatpush3.bf16.msra.mxu0 %v5490_v9 }
0x13f4   :  { %5336 = vmatprep.subr.mxu0 %v5732_v58 }
0x13f6   :  { %5324 = vmatmul.mubr.msk.f32.vlgmr.msra.gmra.mrb[32].mxu0 %vm167_vm0, %v71_v32 }
0x13f7   :  { %5338 = vmatprep.mubr.msk.f32.mxu0 %vm5733_vm5, %v5732_v58 }
0x13fc   :  { %5337 = vmatpush3.xpose.msk.msra.mxu0 %vm464_vm6, %v2846_v55 }
0x13fd   :  { %5346 = vmatprep.subr.mxu0 %v5732_v58 }
0x14c1   :  { %v5303_v59 = vpop.f32.mrb[30].mxu0 }
0x14c2   :  { %v6162_v60 = vadd.f32 %v5303_v59, %v4923_v56  ;;  %v2509_v62 = vpop.f32.mrb[31].mxu0 }
0x14c3   :  { %v6164_v2 = vadd.f32 %v4923_v56, %v2509_v62 }
0x14c5   :  { %2843 = vrot.lane.b32.xlu0 %v6164_v2, %s5734_s3  ;;  %5329 = vmatmul.mubr.msk.f32.vlgmr.msra.gmra.mrb[26].mxu1 %vm464_vm6, %v6164_v2 }
0x14c6   :  { %5333 = vmatprep.mubr.msk.f32.mxu1 %vm5733_vm5, %v5732_v58 }
0x14c9   :  { %v5325_v5 = vpop.f32.mrb[32].mxu0 }
0x14ca   :  { %v6172_v6 = vadd.f32 %v5325_v5, %v4929_v3  ;;  %v2673_v63 = vpop.f32.mrb[33].mxu0 }
0x14cb   :  { %v6174_v7 = vadd.f32 %v4929_v3, %v2673_v63  ;;  %v6243_v3 = vld [vmem:[%s6525_s2 + $0xf0] sm:$0xff] }
0x14cd   :  { %5332 = vmatpush3.msra.mxu1 %v6174_v7 }
0x14ce   :  { %5341 = vmatprep.subr.mxu1 %v5732_v58 }
0x1537   :  { %v2844_v40 = vpop.permute.xlu0 %2843 }
0x1538   :  { %5339 = vmatmul.mubr.msk.f32.vlgmr.msra.gmra.mrb[34].mxu0 %vm464_vm6, %v2844_v40 }
0x1539   :  { %5348 = vmatprep.mubr.msk.f32.mxu0 %vm5733_vm5, %v5732_v58  ;;  %5347 = vmatpush3.msra.mxu0 %v6197_v28 }
0x153a   :  { %5356 = vmatprep.subr.mxu0 %v5732_v58 }
0x1598   :  { %v2754_v1 = vpop.f32.mrb[26].mxu1 }
0x1599   :  { %v2758_v10 = vmul.f32 0.35355338, %v2754_v1  ;;  %v5330_v12 = vpop.f32.mrb[27].mxu1 }
0x159b   :  { %v2759_v13 = vsel %vm464_vm6, %v2758_v10, -inf }
0x159c   :  { %2760 = vmax.xlane.f32.xlu0 %v2759_v13 }
0x160b   :  { %v2917_v14 = vpop.f32.mrb[34].mxu0 }
0x160c   :  { %v2921_v15 = vmul.f32 0.35355338, %v2917_v14  ;;  %v5340_v16 = vpop.f32.mrb[35].mxu0 }
0x160e   :  { %v2922_v17 = vsel %vm464_vm6, %v2921_v15, -inf }
0x160f   :  { %2923 = vmax.xlane.f32.xlu1 %v2922_v17 }
0x1620   :  { %3158 = vrot.lane.b32.xlu1 %v6137_v49, %s5735_s16 }
0x1629   :  { %v2761_v18 = vpop.xlane.xlu0 %2760 }
0x162a   :  { %v2762_v19 = vsub.f32 %v2758_v10, %v2761_v18 }
0x162c   :  { %v2763_v8 = vmul.f32 1.442695, %v2762_v19 }
0x162e   :  { %5593 = vpow2.f32 %v2763_v8 }
0x1638   :  { %v5594_v20 = vpop.eup %5593 }
0x1639   :  { %v2765_v21 = vsel %vm464_vm6, %v5594_v20, 0.0 }
0x163a   :  { %2766 = vadd.xlane.f32.xlu0 %v2765_v21 }
0x169c   :  { %v2924_v22 = vpop.xlane.xlu1 %2923 }
0x169d   :  { %v2925_v23 = vsub.f32 %v2921_v15, %v2924_v22 }
0x169f   :  { %v2926_v24 = vmul.f32 1.442695, %v2925_v23 }
0x16a0   :  { %v3159_v37 = vpop.permute.xlu1 %3158 }
0x16a1   :  { %5595 = vpow2.f32 %v2926_v24 }
0x16ab   :  { %v5596_v25 = vpop.eup %5595 }
0x16ac   :  { %v2928_v4 = vsel %vm464_vm6, %v5596_v25, 0.0 }
0x16ad   :  { %2929 = vadd.xlane.f32.xlu0 %v2928_v4 }
0x16c3   :  { %2934 = vrot.lane.b32.xlu0 %v6174_v7, %s5734_s3 }
0x16c7   :  { %3156 = vrot.lane.b32.xlu0 %v6164_v2, %s5735_s16  ;;  %v2767_v26 = vpop.xlane.xlu0 %2766 }
0x16c8   :  { %5597 = vrcp.f32 %v2767_v26 }
0x16d2   :  { %v5598_v61 = vpop.eup %5597 }
0x16d3   :  { %v2769_v27 = vmul.f32 %v5598_v61, %v5594_v20 }
0x16d5   :  { %5334 = vmatmul.mubr.msk.f32.vlgmr.msra.gmra.mrb[28].mxu1 %vm464_vm6, %v2769_v27 }
0x16d6   :  { %5343 = vmatprep.mubr.msk.f32.mxu1 %vm5733_vm5, %v5732_v58 }
0x173a   :  { %v2930_v29 = vpop.xlane.xlu0 %2929 }
0x173b   :  { %5599 = vrcp.f32 %v2930_v29 }
0x173e   :  { %v2935_v30 = vpop.permute.xlu0 %2934 }
0x173f   :  { %5342 = vmatpush3.msra.mxu1 %v2935_v30 }
0x1740   :  { %5351 = vmatprep.subr.mxu1 %v5732_v58 }
0x1742   :  { %v3157_v39 = vpop.permute.xlu0 %3156 }
0x1745   :  { %v5600_v31 = vpop.eup %5599 }
0x1746   :  { %v2932_v32 = vmul.f32 %v5600_v31, %v5596_v25 }
0x1748   :  { %5344 = vmatmul.mubr.msk.f32.vlgmr.msra.gmra.mrb[30].mxu1 %vm464_vm6, %v2932_v32 }
0x1749   :  { %5352 = vmatpush3.msra.mxu1 %v6205_v33  ;;  %5353 = vmatprep.mubr.msk.f32.mxu1 %vm5733_vm5, %v5732_v58 }
0x174a   :  { %5361 = vmatprep.subr.mxu1 %v5732_v58 }
0x17a8   :  { %v2839_v34 = vpop.f32.mrb[28].mxu1 }
0x17a9   :  { %v5335_v11 = vpop.f32.mrb[29].mxu1  ;;  %5354 = vmatmul.mubr.msk.f32.vlgmr.msra.gmra.mrb[32].mxu1 %vm464_vm6, %v2839_v34 }
0x17aa   :  { %5363 = vmatprep.mubr.msk.f32.mxu1 %vm5733_vm5, %v5732_v58 }
0x181b   :  { %v3006_v36 = vpop.f32.mrb[30].mxu1 }
0x181c   :  { %v5345_v38 = vpop.f32.mrb[31].mxu1  ;;  %5349 = vmatmul.mubr.msk.f32.vlgmr.msra.gmra.mrb[36].mxu0 %vm464_vm6, %v3006_v36 }
0x181d   :  { %5357 = vmatpush3.xpose.msk.msra.mxu0 %vm464_vm6, %v3159_v37  ;;  %5358 = vmatprep.mubr.msk.f32.mxu0 %vm5733_vm5, %v5732_v58 }
0x181e   :  { %5366 = vmatprep.subr.mxu0 %v5732_v58 }
0x1820   :  { %5359 = vmatmul.mubr.msk.f32.vlgmr.msra.gmra.mrb[38].mxu0 %vm464_vm6, %v3157_v39 }
0x1821   :  { %5368 = vmatprep.mubr.msk.f32.mxu0 %vm5733_vm5, %v5732_v58  ;;  %5367 = vmatpush3.msra.mxu0 %v6243_v3 }
0x1822   :  { %5376 = vmatprep.subr.mxu0 %v5732_v58 }
0x187c   :  { %v3152_v41 = vpop.f32.mrb[32].mxu1 }
0x187d   :  { %v5355_v42 = vpop.f32.mrb[33].mxu1 }
0x18ef   :  { %v3079_v0 = vpop.f32.mrb[36].mxu0 }
0x18f0   :  { %v3153_v43 = vadd.f32 %v3152_v41, %v3079_v0  ;;  %v5350_v44 = vpop.f32.mrb[37].mxu0 }
0x18f3   :  { %v3230_v45 = vpop.f32.mrb[38].mxu0 }
0x18f4   :  { %v3234_v46 = vmul.f32 0.35355338, %v3230_v45  ;;  %v5360_v48 = vpop.f32.mrb[39].mxu0 }
0x18f6   :  { %v3235_v50 = vsel %vm464_vm6, %v3234_v46, -inf }
0x18f7   :  { %3236 = vmax.xlane.f32.xlu1 %v3235_v50 }
0x1908   :  { %3398 = vrot.lane.b32.xlu1 %v6137_v49, %s5736_s21 }
0x190c   :  { %3396 = vrot.lane.b32.xlu1 %v6164_v2, %s5736_s21 }
0x1984   :  { %v3237_v51 = vpop.xlane.xlu1 %3236 }
0x1985   :  { %v3238_v52 = vsub.f32 %v3234_v46, %v3237_v51 }
0x1987   :  { %v3239_v53 = vmul.f32 1.442695, %v3238_v52 }
0x1988   :  { %v3399_v59 = vpop.permute.xlu1 %3398 }
0x1989   :  { %5601 = vpow2.f32 %v3239_v53 }
0x198c   :  { %v3397_v2 = vpop.permute.xlu1 %3396 }
0x1993   :  { %v5602_v54 = vpop.eup %5601 }
0x1994   :  { %v3241_v9 = vsel %vm464_vm6, %v5602_v54, 0.0 }
0x1995   :  { %3242 = vadd.xlane.f32.xlu0 %v3241_v9 }
0x19ab   :  { %3246 = vrot.lane.b32.xlu0 %v6174_v7, %s5735_s16 }
0x1a22   :  { %v3243_v55 = vpop.xlane.xlu0 %3242 }
0x1a23   :  { %5603 = vrcp.f32 %v3243_v55 }
0x1a26   :  { %v3247_v56 = vpop.permute.xlu0 %3246 }
0x1a27   :  { %5362 = vmatpush3.msra.mxu1 %v3247_v56 }
0x1a28   :  { %5371 = vmatprep.subr.mxu1 %v5732_v58 }
0x1a2d   :  { %v5604_v49 = vpop.eup %5603 }
0x1a2e   :  { %v3245_v62 = vmul.f32 %v5604_v49, %v5602_v54 }
0x1a30   :  { %5364 = vmatmul.mubr.msk.f32.vlgmr.msra.gmra.mrb[34].mxu1 %vm464_vm6, %v3245_v62 }
0x1a31   :  { %5372 = vmatpush3.xpose.msk.msra.mxu1 %vm464_vm6, %v3399_v59  ;;  %5373 = vmatprep.mubr.msk.f32.mxu1 %vm5733_vm5, %v5732_v58 }
0x1a32   :  { %5381 = vmatprep.subr.mxu1 %v5732_v58 }
0x1a34   :  { %5374 = vmatmul.mubr.msk.f32.vlgmr.msra.gmra.mrb[36].mxu1 %vm464_vm6, %v3397_v2 }
0x1a35   :  { %5383 = vmatprep.mubr.msk.f32.mxu1 %vm5733_vm5, %v5732_v58 }
0x1b03   :  { %v3318_v5 = vpop.f32.mrb[34].mxu1 }
0x1b04   :  { %v5365_v63 = vpop.f32.mrb[35].mxu1  ;;  %5369 = vmatmul.mubr.msk.f32.vlgmr.msra.gmra.mrb[40].mxu0 %vm464_vm6, %v3318_v5 }
0x1b05   :  { %5378 = vmatprep.mubr.msk.f32.mxu0 %vm5733_vm5, %v5732_v58 }
0x1b07   :  { %v3470_v40 = vpop.f32.mrb[36].mxu1 }
0x1b08   :  { %v3474_v1 = vmul.f32 0.35355338, %v3470_v40  ;;  %v5375_v10 = vpop.f32.mrb[37].mxu1 }
0x1b0a   :  { %v3475_v12 = vsel %vm464_vm6, %v3474_v1, -inf }
0x1b0b   :  { %3476 = vmax.xlane.f32.xlu0 %v3475_v12 }
0x1b21   :  { %3486 = vrot.lane.b32.xlu0 %v6174_v7, %s5736_s21  ;;  %v6262_v7 = vld [vmem:[%s6525_s2 + $0xf8] sm:$0xff] }
0x1b22   :  { %5382 = vmatpush3.msra.mxu1 %v6262_v7 }
0x1b23   :  { %5391 = vmatprep.subr.mxu1 %v5732_v58 }
0x1b25   :  { %3797 = vrot.lane.b32.xlu0 %v6162_v60, %s5734_s3 }
0x1b98   :  { %v3477_v13 = vpop.xlane.xlu0 %3476 }
0x1b99   :  { %v3478_v14 = vsub.f32 %v3474_v1, %v3477_v13 }
0x1b9b   :  { %v3479_v15 = vmul.f32 1.442695, %v3478_v14 }
0x1b9c   :  { %v3487_v16 = vpop.permute.xlu0 %3486 }
0x1b9d   :  { %5605 = vpow2.f32 %v3479_v15  ;;  %5377 = vmatpush3.msra.mxu0 %v3487_v16 }
0x1b9e   :  { %5386 = vmatprep.subr.mxu0 %v5732_v58 }
0x1ba0   :  { %v3798_v25 = vpop.permute.xlu0 %3797 }
0x1ba7   :  { %v5606_v17 = vpop.eup %5605 }
0x1ba8   :  { %v3481_v18 = vsel %vm464_vm6, %v5606_v17, 0.0 }
0x1ba9   :  { %3482 = vadd.xlane.f32.xlu1 %v3481_v18 }
0x1bba   :  { %3799 = vrot.lane.b32.xlu1 %v6135_v47, %s5734_s3 }
0x1bd7   :  { %v3391_v19 = vpop.f32.mrb[40].mxu0 }
0x1bd8   :  { %v3395_v8 = vadd.f32 %v3391_v19, %v3153_v43  ;;  %v5370_v20 = vpop.f32.mrb[41].mxu0 }
0x1c36   :  { %v3483_v21 = vpop.xlane.xlu1 %3482 }
0x1c37   :  { %5607 = vrcp.f32 %v3483_v21 }
0x1c3a   :  { %v3800_v24 = vpop.permute.xlu1 %3799 }
0x1c41   :  { %v5608_v22 = vpop.eup %5607 }
0x1c42   :  { %v3485_v23 = vmul.f32 %v5608_v22, %v5606_v17 }
0x1c44   :  { %5379 = vmatmul.mubr.msk.f32.vlgmr.msra.gmra.mrb[42].mxu0 %vm464_vm6, %v3485_v23  ;;  %v4964_v23 = vld [vmem:[#allocation7 + $0xd] ss:$0 sm:$0xff] }
0x1c45   :  { %5387 = vmatpush3.xpose.msk.msra.mxu0 %vm464_vm6, %v6135_v47  ;;  %5388 = vmatprep.mubr.msk.f32.mxu0 %vm5733_vm5, %v5732_v58 }
0x1c46   :  { %5396 = vmatprep.subr.mxu0 %v5732_v58 }
0x1c48   :  { %5389 = vmatmul.mubr.msk.f32.vlgmr.msra.gmra.mrb[44].mxu0 %vm464_vm6, %v6162_v60 }
0x1c49   :  { %5397 = vmatpush3.xpose.msk.msra.mxu0 %vm464_vm6, %v3800_v24  ;;  %5398 = vmatprep.mubr.msk.f32.mxu0 %vm5733_vm5, %v5732_v58 }
0x1c4a   :  { %5406 = vmatprep.subr.mxu0 %v5732_v58 }
0x1c4c   :  { %5399 = vmatmul.mubr.msk.f32.vlgmr.msra.gmra.mrb[46].mxu0 %vm464_vm6, %v3798_v25 }
0x1c4d   :  { %5407 = vmatpush3.msra.mxu0 %v6197_v28  ;;  %5408 = vmatprep.mubr.msk.f32.mxu0 %vm5733_vm5, %v5732_v58 }
0x1c4e   :  { %5416 = vmatprep.subr.mxu0 %v5732_v58 }
0x1d17   :  { %v3558_v4 = vpop.f32.mrb[42].mxu0 }
0x1d18   :  { %v5380_v26 = vpop.f32.mrb[43].mxu0  ;;  %5384 = vmatmul.mubr.msk.f32.vlgmr.msra.gmra.mrb[38].mxu1 %vm464_vm6, %v3558_v4 }
0x1d19   :  { %5392 = vmatpush3.msra.mxu1 %v6172_v6  ;;  %5393 = vmatprep.mubr.msk.f32.mxu1 %vm5733_vm5, %v5732_v58 }
0x1d1a   :  { %5401 = vmatprep.subr.mxu1 %v5732_v58 }
0x1d1b   :  { %v3708_v61 = vpop.f32.mrb[44].mxu0 }
0x1d1c   :  { %v3712_v27 = vmul.f32 0.35355338, %v3708_v61  ;;  %v5390_v29 = vpop.f32.mrb[45].mxu0 }
0x1d1e   :  { %v3713_v28 = vsel %vm464_vm6, %v3712_v27, -inf }
0x1d1f   :  { %3714 = vmax.xlane.f32.xlu1 %v3713_v28  ;;  %v3871_v30 = vpop.f32.mrb[46].mxu0 }
0x1d20   :  { %v3875_v31 = vmul.f32 0.35355338, %v3871_v30  ;;  %v5400_v32 = vpop.f32.mrb[47].mxu0 }
0x1d22   :  { %v3876_v34 = vsel %vm464_vm6, %v3875_v31, -inf }
0x1d23   :  { %3877 = vmax.xlane.f32.xlu0 %v3876_v34 }
0x1d30   :  { %3888 = vrot.lane.b32.xlu1 %v6172_v6, %s5734_s3 }
0x1d34   :  { %4110 = vrot.lane.b32.xlu1 %v6162_v60, %s5735_s16 }
0x1dac   :  { %v3715_v11 = vpop.xlane.xlu1 %3714 }
0x1dad   :  { %v3716_v36 = vsub.f32 %v3712_v27, %v3715_v11 }
0x1daf   :  { %v3717_v37 = vmul.f32 1.442695, %v3716_v36 }
0x1db0   :  { %v3878_v38 = vpop.xlane.xlu0 %3877  ;;  %v3889_v54 = vpop.permute.xlu1 %3888 }
0x1db1   :  { %5609 = vpow2.f32 %v3717_v37  ;;  %v3879_v39 = vsub.f32 %v3875_v31, %v3878_v38 }
0x1db3   :  { %v3880_v41 = vmul.f32 1.442695, %v3879_v39 }
0x1db5   :  { %5611 = vpow2.f32 %v3880_v41 }
0x1dbb   :  { %v5610_v42 = vpop.eup %5609 }
0x1dbc   :  { %v3719_v0 = vsel %vm464_vm6, %v5610_v42, 0.0 }
0x1dbd   :  { %3720 = vadd.xlane.f32.xlu0 %v3719_v0 }
0x1dbf   :  { %v5612_v43 = vpop.eup %5611 }
0x1dc0   :  { %v3882_v44 = vsel %vm464_vm6, %v5612_v43, 0.0 }
0x1dc1   :  { %3883 = vadd.xlane.f32.xlu0 %v3882_v44 }
0x1dd7   :  { %4112 = vrot.lane.b32.xlu0 %v6135_v47, %s5735_s16 }
0x1deb   :  { %v3631_v45 = vpop.f32.mrb[38].mxu1 }
0x1dec   :  { %v6298_v46 = vadd.f32 %v3631_v45, %v3395_v8  ;;  %v5385_v48 = vpop.f32.mrb[39].mxu1 }
0x1dee   :  { %v4594_v4 = vadd.f32 %v4964_v23, %v6298_v46 }
0x1df0   :  { %v6345_v29 = vadd.f32 %v4594_v4, %v6084_v35  ;;  %v112_v4 = vld [vmem:[%s6529_s6 + $0x80] sm:$0xff] }
0x1df2   :  { %v4598_v28 = vsel %vm167_vm0, %v6345_v29, 0.0 }
0x1e4a   :  { %v3721_v50 = vpop.xlane.xlu0 %3720 }
0x1e4b   :  { %5613 = vrcp.f32 %v3721_v50 }
0x1e4e   :  { %v3884_v51 = vpop.xlane.xlu0 %3883 }
0x1e4f   :  { %5615 = vrcp.f32 %v3884_v51 }
0x1e52   :  { %v4113_v62 = vpop.permute.xlu0 %4112 }
0x1e55   :  { %v5614_v52 = vpop.eup %5613 }
0x1e56   :  { %v3723_v53 = vmul.f32 %v5614_v52, %v5610_v42 }
0x1e58   :  { %5394 = vmatmul.mubr.msk.f32.vlgmr.msra.gmra.mrb[40].mxu1 %vm464_vm6, %v3723_v53 }
0x1e59   :  { %v5616_v9 = vpop.eup %5615  ;;  %5402 = vmatpush3.msra.mxu1 %v3889_v54  ;;  %5403 = vmatprep.mubr.msk.f32.mxu1 %vm5733_vm5, %v5732_v58 }
0x1e5a   :  { %v3886_v55 = vmul.f32 %v5616_v9, %v5612_v43  ;;  %5411 = vmatprep.subr.mxu1 %v5732_v58 }
0x1e5c   :  { %5404 = vmatmul.mubr.msk.f32.vlgmr.msra.gmra.mrb[42].mxu1 %vm464_vm6, %v3886_v55  ;;  %v89_v55 = vld [vmem:[%s6527_s4 + $0x8] sm:$0xff] }
0x1e5d   :  { %5412 = vmatpush3.msra.mxu1 %v6205_v33  ;;  %5413 = vmatprep.mubr.msk.f32.mxu1 %vm5733_vm5, %v5732_v58  ;;  %v4111_v33 = vpop.permute.xlu1 %4110 }
0x1e5e   :  { %5421 = vmatprep.subr.mxu1 %v5732_v58 }
0x1f2b   :  { %v3793_v56 = vpop.f32.mrb[40].mxu1 }
0x1f2c   :  { %v5395_v49 = vpop.f32.mrb[41].mxu1  ;;  %5414 = vmatmul.mubr.msk.f32.vlgmr.msra.gmra.mrb[44].mxu1 %vm464_vm6, %v3793_v56  ;;  %v91_v56 = vld [vmem:[%s6527_s4 + $0x18] sm:$0xff] }
0x1f2d   :  { %5423 = vmatprep.mubr.msk.f32.mxu1 %vm5733_vm5, %v5732_v58  ;;  %v5494_v49 = vpack.c.bf16 %v91_v56, %v89_v55 }
0x1f2f   :  { %v3960_v59 = vpop.f32.mrb[42].mxu1 }
0x1f30   :  { %v5405_v2 = vpop.f32.mrb[43].mxu1  ;;  %5409 = vmatmul.mubr.msk.f32.vlgmr.msra.gmra.mrb[48].mxu0 %vm464_vm6, %v3960_v59  ;;  %v90_v59 = vld [vmem:[%s6527_s4 + $0x10] sm:$0xff] }
0x1f31   :  { %5417 = vmatpush3.xpose.msk.msra.mxu0 %vm464_vm6, %v4113_v62  ;;  %5418 = vmatprep.mubr.msk.f32.mxu0 %vm5733_vm5, %v5732_v58  ;;  %v93_v62 = vld [vmem:[%s6527_s4 + $0x28] sm:$0xff]  ;;  %v95_v2 = vld [vmem:[%s6527_s4 + $0x38] sm:$0xff] }
0x1f32   :  { %5426 = vmatprep.subr.mxu0 %v5732_v58 }
0x1f34   :  { %5419 = vmatmul.mubr.msk.f32.vlgmr.msra.gmra.mrb[50].mxu0 %vm464_vm6, %v4111_v33 }
0x1f35   :  { %5427 = vmatpush3.msra.mxu0 %v6243_v3  ;;  %5428 = vmatprep.mubr.msk.f32.mxu0 %vm5733_vm5, %v5732_v58 }
0x1f36   :  { %5436 = vmatprep.subr.mxu0 %v5732_v58 }
0x1fff   :  { %v4106_v5 = vpop.f32.mrb[44].mxu1 }
0x2000   :  { %v5415_v63 = vpop.f32.mrb[45].mxu1 }
0x2001   :  { %v92_v63 = vld [vmem:[%s6527_s4 + $0x20] sm:$0xff] }
0x2003   :  { %v4033_v40 = vpop.f32.mrb[48].mxu0 }
0x2004   :  { %v4107_v1 = vadd.f32 %v4106_v5, %v4033_v40  ;;  %v5410_v10 = vpop.f32.mrb[49].mxu0  ;;  %v5498_v5 = vpack.c.bf16 %v95_v2, %v93_v62  ;;  %v94_v40 = vld [vmem:[%s6527_s4 + $0x30] sm:$0xff]  ;;  %v125_v62 = vld [vmem:[%s6529_s6 + $0xe8] sm:$0xff] }
0x2007   :  { %v4184_v12 = vpop.f32.mrb[50].mxu0 }
0x2008   :  { %v4188_v13 = vmul.f32 0.35355338, %v4184_v12  ;;  %v5420_v14 = vpop.f32.mrb[51].mxu0 }
0x200a   :  { %v4189_v15 = vsel %vm464_vm6, %v4188_v13, -inf }
0x200b   :  { %4190 = vmax.xlane.f32.xlu1 %v4189_v15 }
0x201c   :  { %4352 = vrot.lane.b32.xlu1 %v6135_v47, %s5736_s21 }
0x2020   :  { %4350 = vrot.lane.b32.xlu1 %v6162_v60, %s5736_s21 }
0x2098   :  { %v4191_v3 = vpop.xlane.xlu1 %4190 }
0x2099   :  { %v4192_v16 = vsub.f32 %v4188_v13, %v4191_v3 }
0x209b   :  { %v4193_v17 = vmul.f32 1.442695, %v4192_v16 }
0x209c   :  { %v4353_v21 = vpop.permute.xlu1 %4352 }
0x209d   :  { %5617 = vpow2.f32 %v4193_v17 }
0x20a0   :  { %v4351_v22 = vpop.permute.xlu1 %4350 }
0x20a7   :  { %v5618_v18 = vpop.eup %5617 }
0x20a8   :  { %v4195_v19 = vsel %vm464_vm6, %v5618_v18, 0.0 }
0x20a9   :  { %4196 = vadd.xlane.f32.xlu0 %v4195_v19 }
0x20bf   :  { %4200 = vrot.lane.b32.xlu0 %v6172_v6, %s5735_s16 }
0x2136   :  { %v4197_v8 = vpop.xlane.xlu0 %4196 }
0x2137   :  { %5619 = vrcp.f32 %v4197_v8 }
0x213a   :  { %v4201_v20 = vpop.permute.xlu0 %4200 }
0x213b   :  { %5422 = vmatpush3.msra.mxu1 %v4201_v20 }
0x213c   :  { %5431 = vmatprep.subr.mxu1 %v5732_v58 }
0x2141   :  { %v5620_v47 = vpop.eup %5619 }
0x2142   :  { %v4199_v60 = vmul.f32 %v5620_v47, %v5618_v18 }
0x2144   :  { %5424 = vmatmul.mubr.msk.f32.vlgmr.msra.gmra.mrb[46].mxu1 %vm464_vm6, %v4199_v60  ;;  %v6393_v60 = vld [vmem:[#allocation7 + $0x4] ss:$0 sm:$0xff] }
0x2145   :  { %5432 = vmatpush3.xpose.msk.msra.mxu1 %vm464_vm6, %v4353_v21  ;;  %5433 = vmatprep.mubr.msk.f32.mxu1 %vm5733_vm5, %v5732_v58 }
0x2146   :  { %5441 = vmatprep.subr.mxu1 %v5732_v58 }
0x2148   :  { %5434 = vmatmul.mubr.msk.f32.vlgmr.msra.gmra.mrb[48].mxu1 %vm464_vm6, %v4351_v22 }
0x2149   :  { %5442 = vmatpush3.msra.mxu1 %v6262_v7  ;;  %5443 = vmatprep.mubr.msk.f32.mxu1 %vm5733_vm5, %v5732_v58 }
0x2217   :  { %v4272_v24 = vpop.f32.mrb[46].mxu1 }
0x2218   :  { %v5425_v25 = vpop.f32.mrb[47].mxu1  ;;  %5429 = vmatmul.mubr.msk.f32.vlgmr.msra.gmra.mrb[52].mxu0 %vm464_vm6, %v4272_v24 }
0x2219   :  { %5438 = vmatprep.mubr.msk.f32.mxu0 %vm5733_vm5, %v5732_v58 }
0x221b   :  { %v4424_v26 = vpop.f32.mrb[48].mxu1 }
0x221c   :  { %v4428_v61 = vmul.f32 0.35355338, %v4424_v26  ;;  %v5435_v27 = vpop.f32.mrb[49].mxu1  ;;  %v113_v26 = vld [vmem:[%s6529_s6 + $0x88] sm:$0xff] }
0x221d   :  { %v5502_v27 = vpack.c.bf16 %v113_v26, %v112_v4  ;;  %v4651_v26 = vlaneseq }
0x221e   :  { %v4429_v7 = vsel %vm464_vm6, %v4428_v61, -inf }
0x221f   :  { %4430 = vmax.xlane.f32.xlu1 %v4429_v7  ;;  %v97_v7 = vld [vmem:[%s6529_s6 + $0x8] sm:$0xff]  ;;  %5503 = vmatprep.subr.bf16.mxu1 %v5502_v27 }
0x2223   :  { %4599 = vadd.xlane.f32.xlu1 %v4598_v28  ;;  %v115_v28 = vld [vmem:[%s6529_s6 + $0x98] sm:$0xff] }
0x22ac   :  { %v4431_v30 = vpop.xlane.xlu1 %4430 }
0x22ad   :  { %v4432_v31 = vsub.f32 %v4428_v61, %v4431_v30  ;;  %v96_v61 = vld [vmem:[%s6529_s6] sm:$0xff] }
0x22ae   :  { %v5504_v30 = vpack.c.bf16 %v97_v7, %v96_v61  ;;  %v4652_v61 = vshrl.u32 %v4651_v26, 7  ;;  %v87_v7 = vld [vmem:[%s6528_s5] sm:$0x3]  ;;  %s5737_s5 = smov [#allocation8]  }
0x22af   :  { %v4433_v32 = vmul.f32 1.442695, %v4432_v31 }
0x22b0   :  { %v4600_v44 = vpop.xlane.xlu1 %4599  ;;  %v4653_v27 = vsub.s32 0, %v4652_v61 }
0x22b1   :  { %5621 = vpow2.f32 %v4433_v32  ;;  %v4604_v45 = vmul.f32 0.03125, %v4600_v44  ;;  %v98_v32 = vld [vmem:[%s6529_s6 + $0x10] sm:$0xff] }
0x22b2   :  { %v102_v44 = vld [vmem:[%s6529_s6 + $0x30] sm:$0xff] }
0x22b3   :  { %v4606_v50 = vsub.f32 %v6345_v29, %v4604_v45  ;;  %v103_v45 = vld [vmem:[%s6529_s6 + $0x38] sm:$0xff] }
0x22b5   :  { %v4608_v54 = vmul.f32 %v4606_v50, %v4606_v50 }
0x22b7   :  { %v4610_v9 = vsel %vm167_vm0, %v4608_v54, 0.0  ;;  %v122_v54 = vld [vmem:[%s6529_s6 + $0xd0] sm:$0xff] }
0x22bb   :  { %v5622_v34 = vpop.eup %5621 }
0x22bc   :  { %v4435_v11 = vsel %vm464_vm6, %v5622_v34, 0.0 }
0x22bd   :  { %4436 = vadd.xlane.f32.xlu0 %v4435_v11  ;;  %v116_v11 = vld [vmem:[%s6529_s6 + $0xa0] sm:$0xff] }
0x22d3   :  { %4440 = vrot.lane.b32.xlu0 %v6172_v6, %s5736_s21  ;;  %s4836_s21 = sshll.u32 %s5737_s5, 4  ;;  %s4837_s21 = int_to_ptr.vmem [resolvable:$true] %s4836_s21 }
0x22d4   :  { %s5699_s0 = scalar_lea.vmem %s4837_s21, 256  ;;  %p5704_p11 = scmp.lt.s32.totalorder %s4837_s21, %s4837_s21 }
0x22d5   :  { %p5700_p10 = scmp.ne.s32.totalorder %s4837_s21, %s5699_s0  ;;  %p5705_p12 = scmp.lt.s32.totalorder %s5699_s0, %s5699_s0 }
0x22d7   :  { %p5706_p13 = por %p5705_p12, %p5704_p11 }
0x22d9   :  { %p5707_p0 = pnand %p5706_p13, %p5700_p10 }
0x22eb   :  { %v4345_v35 = vpop.f32.mrb[52].mxu0 }
0x22ec   :  { %v4349_v36 = vadd.f32 %v4345_v35, %v4107_v1  ;;  %v5430_v37 = vpop.f32.mrb[53].mxu0  ;;  %v5500_v1 = vpack.c.bf16 %v94_v40, %v92_v63  ;;  %v117_v35 = vld [vmem:[%s6529_s6 + $0xa8] sm:$0xff] }
0x22ed   :  { %v5510_v37 = vpack.c.bf16 %v117_v35, %v116_v11  ;;  %v109_v63 = vld [vmem:[%s6529_s6 + $0x68] sm:$0xff] }
0x234a   :  { %v4437_v38 = vpop.xlane.xlu0 %4436 }
0x234b   :  { %5623 = vrcp.f32 %v4437_v38  ;;  %v100_v38 = vld [vmem:[%s6529_s6 + $0x20] sm:$0xff] }
0x234e   :  { %v4441_v39 = vpop.permute.xlu0 %4440 }
0x234f   :  { %5437 = vmatpush3.msra.mxu0 %v4441_v39  ;;  %v101_v39 = vld [vmem:[%s6529_s6 + $0x28] sm:$0xff] }
0x2350   :  { %5495 = vmatprep.subr.bf16.mxu0 %v5494_v49  ;;  %v107_v49 = vld [vmem:[%s6529_s6 + $0x58] sm:$0xff] }
0x2355   :  { %v5624_v41 = vpop.eup %5623 }
0x2356   :  { %v4439_v42 = vmul.f32 %v5624_v41, %v5622_v34  ;;  %v99_v34 = vld [vmem:[%s6529_s6 + $0x18] sm:$0xff]  ;;  %v118_v41 = vld [vmem:[%s6529_s6 + $0xb0] sm:$0xff] }
0x2358   :  { %5439 = vmatmul.mubr.msk.f32.vlgmr.msra.gmra.mrb[54].mxu0 %vm464_vm6, %v4439_v42  ;;  %v119_v42 = vld [vmem:[%s6529_s6 + $0xb8] sm:$0xff] }
0x2359   :  { %4731 = vmatprep.mubr.f32.mxu0 %v5732_v58 }
0x242b   :  { %v4512_v0 = vpop.f32.mrb[54].mxu0 }
0x242c   :  { %v5440_v43 = vpop.f32.mrb[55].mxu0  ;;  %5444 = vmatmul.mubr.msk.f32.vlgmr.msra.gmra.mrb[50].mxu1 %vm464_vm6, %v4512_v0  ;;  %v5512_v0 = vpack.c.bf16 %v101_v39, %v100_v38 }
0x242d   :  { %5505 = vmatpush3.bf16.msra.mxu1 %v5504_v30  ;;  %v5514_v43 = vpack.c.bf16 %v119_v42, %v118_v41  ;;  %v4969_v42 = vld [vmem:[#allocation7 + $0xe] ss:$0 sm:$0xff] }
0x24ff   :  { %v4585_v6 = vpop.f32.mrb[50].mxu1 }
0x2500   :  { %v4589_v46 = vadd.f32 %v4585_v6, %v4349_v36  ;;  %v5445_v48 = vpop.f32.mrb[51].mxu1  ;;  %v5508_v36 = vpack.c.bf16 %v99_v34, %v98_v32  ;;  %v120_v6 = vld [vmem:[%s6529_s6 + $0xc0] sm:$0xff] }
0x2501   :  { %v5516_v48 = vpack.c.bf16 %v103_v45, %v102_v44 }
0x2502   :  { %v4595_v51 = vadd.f32 %v4964_v23, %v4589_v46  ;;  %v6395_v23 = vld [vmem:[#allocation7 + $0x5] ss:$0 sm:$0xff]  ;;  %v121_v46 = vld [vmem:[%s6529_s6 + $0xc8] sm:$0xff] }
0x2504   :  { %v6358_v52 = vadd.f32 %v4595_v51, %v6096_v57  ;;  %v88_v57 = vld [vmem:[%s6527_s4] sm:$0xff] }
0x2505   :  { %v5496_v33 = vpack.c.bf16 %v90_v59, %v88_v57  ;;  %v104_v51 = vld [vmem:[%s6529_s6 + $0x40] sm:$0xff]  ;;  %v106_v57 = vld [vmem:[%s6529_s6 + $0x50] sm:$0xff] }
0x2506   :  { %v4601_v53 = vsel %vm167_vm0, %v6358_v52, 0.0  ;;  %v124_v59 = vld [vmem:[%s6529_s6 + $0xe0] sm:$0xff]  ;;  %v5524_v2 = vpack.c.bf16 %v107_v49, %v106_v57 }
0x2507   :  { %4602 = vadd.xlane.f32.xlu1 %v4601_v53  ;;  %5497 = vmatpush1.bf16.msra.mxu0 %v5496_v33  ;;  %v105_v53 = vld [vmem:[%s6529_s6 + $0x48] sm:$0xff]  ;;  %v5526_v33 = vpack.c.bf16 %v125_v62, %v124_v59 }
0x2508   :  { %5499 = vmatprep.subr.bf16.mxu0 %v5498_v5  ;;  %v5520_v55 = vpack.c.bf16 %v105_v53, %v104_v51  ;;  %v108_v5 = vld [vmem:[%s6529_s6 + $0x60] sm:$0xff] }
0x2509   :  { %v5528_v40 = vpack.c.bf16 %v109_v63, %v108_v5 }
0x250b   :  { %4611 = vadd.xlane.f32.xlu1 %v4610_v9  ;;  %5501 = vmatpush1.bf16.msra.mxu0 %v5500_v1  ;;  %v123_v9 = vld [vmem:[%s6529_s6 + $0xd8] sm:$0xff]  ;;  %v126_v1 = vld [vmem:[%s6529_s6 + $0xf0] sm:$0xff] }
0x250c   :  { %v5522_v56 = vpack.c.bf16 %v123_v9, %v122_v54 }
0x2594   :  { %v4603_v10 = vpop.xlane.xlu1 %4602 }
0x2595   :  { %v4605_v12 = vmul.f32 0.03125, %v4603_v10  ;;  %v127_v10 = vld [vmem:[%s6529_s6 + $0xf8] sm:$0xff] }
0x2597   :  { %v6388_v13 = vsub.f32 %v6358_v52, %v4605_v12  ;;  %v5530_v12 = vpack.c.bf16 %v127_v10, %v126_v1 }
0x2598   :  { %v4612_v14 = vpop.xlane.xlu1 %4611 }
0x2599   :  { %v4616_v15 = vmul.f32 0.032258064, %v4612_v14  ;;  %v4609_v3 = vmul.f32 %v6388_v13, %v6388_v13  ;;  %v110_v14 = vld [vmem:[%s6529_s6 + $0x70] sm:$0xff] }
0x259b   :  { %5625 = vrsqrt.f32 %v4616_v15  ;;  %v4613_v16 = vsel %vm167_vm0, %v4609_v3, 0.0  ;;  %vm4620_vm11 = vcmp.eq.f32.partialorder %v4616_v15, inf  ;;  %v4623_v19 = vand.u32 2147483648, %v4616_v15 }
0x259c   :  { %4614 = vadd.xlane.f32.xlu1 %v4613_v16  ;;  %vm4622_vm12 = vcmp.eq.f32.partialorder %v4616_v15, 0.0 }
0x25a5   :  { %v5626_v17 = vpop.eup %5625 }
0x25a6   :  { %v4619_v18 = vmul.f32 %v5626_v17, %v4616_v15 }
0x25a8   :  { %v4621_v8 = vsel %vm4620_vm11, %v4616_v15, %v4619_v18  ;;  %v111_v15 = vld [vmem:[%s6529_s6 + $0x78] sm:$0xff] }
0x25a9   :  { %v4624_v20 = vsel %vm4622_vm12, %v4623_v19, %v4621_v8  ;;  %v5532_v3 = vpack.c.bf16 %v111_v15, %v110_v14 }
0x25aa   :  { %v4632_v47 = vadd.f32 1e-06, %v4624_v20 }
0x25ac   :  { %5627 = vrcp.f32 %v4632_v47 }
0x25b6   :  { %v5628_v21 = vpop.eup %5627 }
0x25b7   :  { %v4636_v22 = vmul.f32 %v5628_v21, %v4606_v50  ;;  %v5518_v50 = vpack.c.bf16 %v121_v46, %v120_v6 }
0x25b9   :  { %v4642_v24 = vmul.f32 %v6393_v60, %v4636_v22 }
0x25bb   :  { %v4648_v25 = vadd.f32 %v6395_v23, %v4642_v24 }
0x25bd   :  { %4967 = vmatmul.mubr.msk.f32.vlgmr.msra.gmra.mrb[56].mxu0 %vm167_vm0, %v4648_v25 }
0x25be   :  { %4737 = vmatprep.mubr.f32.mxu0 %v5732_v58  ;;  %v114_v58 = vld [vmem:[%s6529_s6 + $0x90] sm:$0xff] }
0x25bf   :  { %v5506_v31 = vpack.c.bf16 %v115_v28, %v114_v58  ;;  %v4657_v58 = vsub.s32 1, %v4652_v61  ;;  %v4654_v28 = vrot.slane %v87_v7, %v4653_v27 }
0x25c1   :  { %5507 = vmatprep.subr.bf16.mxu1 %v5506_v31  ;;  %v4658_v30 = vrot.slane %v87_v7, %v4657_v58 }
0x25c2   :  { %5509 = vmatpush3.bf16.msra.mxu1 %v5508_v36 }
0x25c3   :  { %5511 = vmatprep.subr.bf16.mxu1 %v5510_v37 }
0x25c6   :  { %5513 = vmatpush3.bf16.msra.mxu1 %v5512_v0 }
0x25c7   :  { %5515 = vmatprep.subr.bf16.mxu1 %v5514_v43 }
0x25ca   :  { %5517 = vmatpush3.bf16.msra.mxu1 %v5516_v48 }
0x25cb   :  { %5519 = vmatprep.subr.bf16.mxu1 %v5518_v50 }
0x25ce   :  { %5521 = vmatpush3.bf16.msra.mxu1 %v5520_v55 }
0x25cf   :  { %5523 = vmatprep.subr.bf16.mxu1 %v5522_v56 }
0x25d2   :  { %5525 = vmatpush3.bf16.msra.mxu1 %v5524_v2 }
0x25d3   :  { %5527 = vmatprep.subr.bf16.mxu1 %v5526_v33 }
0x25d6   :  { %5529 = vmatpush3.bf16.msra.mxu1 %v5528_v40 }
0x25d7   :  { %5531 = vmatprep.subr.bf16.mxu1 %v5530_v12 }
0x25da   :  { %5533 = vmatpush3.bf16.msra.mxu1 %v5532_v3 }
0x2629   :  { %v4615_v16 = vpop.xlane.xlu1 %4614 }
0x262a   :  { %v4617_v17 = vmul.f32 0.032258064, %v4615_v16 }
0x262c   :  { %5629 = vrsqrt.f32 %v4617_v17  ;;  %vm4627_vm13 = vcmp.eq.f32.partialorder %v4617_v17, inf  ;;  %v4630_v8 = vand.u32 2147483648, %v4617_v17  ;;  %vm4629_vm14 = vcmp.eq.f32.partialorder %v4617_v17, 0.0 }
0x2636   :  { %v5630_v18 = vpop.eup %5629 }
0x2637   :  { %v4626_v19 = vmul.f32 %v5630_v18, %v4617_v17 }
0x2639   :  { %v4628_v20 = vsel %vm4627_vm13, %v4617_v17, %v4626_v19 }
0x263a   :  { %v4631_v47 = vsel %vm4629_vm14, %v4630_v8, %v4628_v20 }
0x263b   :  { %v4633_v21 = vadd.f32 1e-06, %v4631_v47 }
0x263d   :  { %5631 = vrcp.f32 %v4633_v21 }
0x2647   :  { %v5632_v22 = vpop.eup %5631 }
0x2648   :  { %v4637_v24 = vmul.f32 %v5632_v22, %v6388_v13 }
0x264a   :  { %v4643_v25 = vmul.f32 %v6393_v60, %v4637_v24 }
0x264c   :  { %v4649_v4 = vadd.f32 %v6395_v23, %v4643_v25 }
0x264e   :  { %4968 = vmatmul.mubr.msk.f32.gmra.mrb[58].mxu0 %vm167_vm0, %v4649_v4 }
0x2690   :  { %v4733_v31 = vpop.f32.mrb[56].mxu0 }
0x2691   :  { %v4734_v32 = vadd.f32 %v4733_v31, %v4654_v28  ;;  %v4735_v34 = vpop.f32.mrb[57].mxu0 }
0x2692   :  { %v4736_v13 = vadd.f32 %v4735_v34, %v4658_v30 }
0x2693   :  { %v4744_v60 = vmax.f32 %v4734_v32, 0.0 }
0x2694   :  { %v4745_v11 = vmax.f32 %v4736_v13, 0.0 }
0x2696   :  { %4816 = vmatprep.mubr.f32.mxu1 %v4745_v11 }
0x2697   :  { %4817 = vmatmul.mubr.f32.vlgmr.msra.gmra.mrb[52].mxu1 %v4744_v60 }
0x2721   :  { %v4739_v23 = vpop.f32.mrb[58].mxu0 }
0x2722   :  { %v4740_v35 = vadd.f32 %v4739_v23, %v4654_v28  ;;  %v4741_v36 = vpop.f32.mrb[59].mxu0 }
0x2723   :  { %v4742_v37 = vadd.f32 %v4741_v36, %v4658_v30 }
0x2724   :  { %v4746_v39 = vmax.f32 %v4740_v35, 0.0 }
0x2725   :  { %v4747_v38 = vmax.f32 %v4742_v37, 0.0 }
0x2727   :  { %4821 = vmatprep.mubr.f32.mxu1 %v4747_v38 }
0x2728   :  { %4822 = vmatmul.mubr.f32.gmra.mrb[54].mxu1 %v4746_v39 }
0x276a   :  { %v5134_v41 = vpop.f32.mrb[52].mxu1 }
0x276b   :  { %v5135_v0 = vpop.f32.mrb[53].mxu1 }
0x276c   :  { %v5136_v43 = vadd.f32 %v5135_v0, %v5134_v41 }
0x276e   :  { %v4819_v44 = vadd.f32 %v5136_v43, %v4969_v42 }
0x2770   :  { %v4827_v45 = vadd.f32 %v4819_v44, %v6345_v29 }
0x2772   :  { %4829 = vst.msk [vmem:[#allocation8] sm:$0xff] %vm167_vm0, %v4827_v45 }
0x27fb   :  { %v5137_v6 = vpop.f32.mrb[54].mxu1 }
0x27fc   :  { %v5138_v46 = vpop.f32.mrb[55].mxu1 }
0x27fd   :  { %v5139_v48 = vadd.f32 %v5138_v46, %v5137_v6 }
0x27ff   :  { %v4824_v50 = vadd.f32 %v5139_v48, %v4969_v42 }
0x2801   :  { %v4828_v51 = vadd.f32 %v4824_v50, %v6358_v52 }
0x2803   :  { %4830 = vst.msk [vmem:[#allocation8 + $0x8] sm:$0xff] %vm167_vm0, %v4828_v51 }
0x2804   :  { %5710 = shalt.err (!%p5707_p0)
}
0x2805   :  { %s5711_s18 = scalar_lea.hbm %s6530_s7, 256 }
0x2806   :  { %p5712_p1 = scmp.ne.s32.totalorder %s6530_s7, %s5711_s18  ;;  %p5715_p2 = scmp.lt.u32.totalorder %s5711_s18, %s6530_s7 }
0x2808   :  { %p5717_p3 = pnand %p5715_p2, %p5712_p1 }
0x280a   :  { %5720 = shalt.err (!%p5717_p3)
}
0x280b   :  { %4842 = dma.vmem_to_hbm [thread:$0]  %s4837_s21, 256, %s6530_s7, [#allocation4], %s5729_s13, %s5729_s13, %s5730_s14  }
0x280c   :  { %5725 = dma.done.wait [#allocation4], 256  }
0x280d   :  { %5726 = vsyncadd [#allocation4], 4294967040 }
0x280e   :  { %4846 = vsyncpa [#allocation3], 1 }
0x280f   :  { %4847 = vsyncpa [#allocation6], 1 }
0x2810   :  { %4848 = vsyncpa [#allocation4], 1 }

</bundles_post_ra>
